<compile_context>
chip_gen: v5e
topology: v5e:2x2
jax: 0.10.0
libtpu: 0.0.40
codegen_flags: <defaults>
</compile_context>

<pallas_src>
import functools

import jax
import jax.numpy as jnp
from jax.experimental import pallas as pl
from jax.experimental.pallas import tpu as pltpu

CPAD = 128          # lane-padded channel width
NCPAD = 128         # lane-padded logits width


def _device_kind():
    try:
        return jax.devices()[0].device_kind.lower()
    except Exception:
        return ""


_DEVICE_KIND = _device_kind()
_IS_V5 = "v5" in _DEVICE_KIND
# v7x has 64 MiB VMEM per TensorCore -> keep headroom; v5e/v6e have 128 MiB.
_VMEM_LIMIT = (48 * 1024 * 1024 if "v7" in _DEVICE_KIND else
               96 * 1024 * 1024 if ("v6" in _DEVICE_KIND or _IS_V5) else
               48 * 1024 * 1024)


# ---------------------------------------------------------------------------
# Small helpers
# ---------------------------------------------------------------------------
def _round_up(x, m):
    return (x + m - 1) // m * m


def _cdiv(a, b):
    return -(-a // b)


def _pad_last(x, target):
    c = x.shape[-1]
    if c == target:
        return x
    return jnp.pad(x, [(0, 0)] * (x.ndim - 1) + [(0, target - c)])


def _tile_rows(rows):
    """Row padding + tile size: multiple of 16 (bf16 sublane packing), cap 1024,
    and >=2 row tiles whenever possible so the parallel axis can feed both
    v7x TensorCores."""
    rows_pad = _round_up(rows, 16)
    if rows_pad <= 16:
        return rows_pad, rows_pad
    n_tiles = max(2, _cdiv(rows_pad, 1024))
    tile_m = _round_up(_cdiv(rows_pad, n_tiles), 16)
    rows_pad = n_tiles * tile_m
    return rows_pad, tile_m


def _k_tile(k_pad):
    """Matmul K block: 256 fills the v6e/v7x 256-wide MXU; 128 on v5e."""
    pref = 128 if _IS_V5 else 256
    return pref if k_pad % pref == 0 else 128


# ---------------------------------------------------------------------------
# Fused conv kernel:  [optional BN+ReLU prologue] -> packed-K matmul accumulate
#                     (bf16 MXU, f32 VMEM accumulator) -> [+shift, optional ReLU]
# grid = (row_tiles, k_tiles);  K axis is the reduction ("arbitrary", last).
# ---------------------------------------------------------------------------
def _fused_conv_kernel(taps_ref, w_ref, in_scale_ref, in_shift_ref, out_shift_ref,
                       o_ref, acc_ref, *, pre_act, out_relu):
    k = pl.program_id(1)

    @pl.when(k == 0)
    def _init():
        acc_ref[...] = jnp.zeros_like(acc_ref)

    p = taps_ref[...]
    if pre_act:
        # pre-activation BN + ReLU (DenseNet ordering) in f32 on upcast bf16 taps
        p = jnp.maximum(p.astype(jnp.float32) * in_scale_ref[...]
                        + in_shift_ref[...], 0.0)
        p = p.astype(jnp.bfloat16)
    acc_ref[...] += jnp.dot(p, w_ref[...], preferred_element_type=jnp.float32)

    @pl.when(k == pl.num_programs(1) - 1)
    def _finalize():
        y = acc_ref[...] + out_shift_ref[...]
        if out_relu:
            y = jnp.maximum(y, 0.0)
        o_ref[...] = y.astype(o_ref.dtype)


def fused_conv(x_pad, c_in, w_hwio, *, stride, pad, pre_bn=None, post_bn=None,
               out_relu=False, eps=1e-5):
    """x_pad: [N,H,W,CPAD] bf16 (real channels = c_in, rest zero).
    Returns ([N,Ho,Wo,CPAD] bf16, cout)."""
    n, h, w_dim, _ = x_pad.shape
    kh, kw, cin_w, cout = w_hwio.shape
    assert cin_w == c_in and c_in <= CPAD and cout <= CPAD
    kk = kh * kw
    pre_act = pre_bn is not None
    # pre-activation BN+ReLU only used with pad==0 (true for DenseNet 1x1 convs);
    # spatially padded zeros would otherwise pick up relu(shift).
    assert not (pre_act and pad != 0)

    # Fold the *following* BN's scale into the weight columns, its shift is the bias.
    w = w_hwio.astype(jnp.float32)
    if post_bn is not None:
        s_out = post_bn["gamma"] / jnp.sqrt(post_bn["var"] + eps)
        out_shift = post_bn["beta"] - post_bn["mean"] * s_out
        w = w * s_out[None, None, None, :]
    else:
        out_shift = jnp.zeros((cout,), jnp.float32)
    out_shift_p = _pad_last(out_shift[None, :], CPAD)              # [1, CPAD]

    ho = (h + 2 * pad - kh) // stride + 1
    wo = (w_dim + 2 * pad - kw) // stride + 1
    rows = n * ho * wo
    rows_pad, tile_m = _tile_rows(rows)

    # 1x1/s1/p0 convs reuse the lane-padded activation directly (zero-copy).
    reuse_input = (kh == 1 and kw == 1 and stride == 1 and pad == 0)
    k_real = kk * c_in
    k_pad = CPAD if reuse_input else _round_up(k_real, 128)

    # Packed weight [K_pad, CPAD] in im2col K layout, pre-cast to bf16.
    w_flat = w.reshape(k_real, cout)
    w_p = jnp.zeros((k_pad, CPAD), jnp.float32).at[:k_real, :cout].set(w_flat)
    w_p = w_p.astype(jnp.bfloat16)

    # Optional pre-activation BN scale/shift, replicated per tap along K.
    if pre_act:
        s_in = pre_bn["gamma"] / jnp.sqrt(pre_bn["var"] + eps)
        sh_in = pre_bn["beta"] - pre_bn["mean"] * s_in
        in_scale_p = jnp.pad(jnp.tile(s_in, kk), (0, k_pad - k_real))[None, :]
        in_shift_p = jnp.pad(jnp.tile(sh_in, kk), (0, k_pad - k_real))[None, :]
    else:
        in_scale_p = jnp.zeros((1, k_pad), jnp.float32)
        in_shift_p = jnp.zeros((1, k_pad), jnp.float32)

    # im2col taps: [rows_pad, K_pad] bf16; only the real channels are packed,
    # so there is no KK-duplicated, zero-lane tap stack in HBM anymore.
    if reuse_input:
        taps = x_pad.reshape(rows, CPAD)
    else:
        xp = jnp.pad(x_pad, ((0, 0), (pad, pad), (pad, pad), (0, 0)))
        cols = []
        for i in range(kh):
            for j in range(kw):
                cols.append(xp[:, i:i + stride * ho:stride,
                               j:j + stride * wo:stride, :c_in])
        taps = jnp.concatenate(cols, axis=-1).reshape(rows, k_real)
        if k_pad != k_real:
            taps = jnp.pad(taps, ((0, 0), (0, k_pad - k_real)))
    if rows_pad != rows:
        taps = jnp.pad(taps, ((0, rows_pad - rows), (0, 0)))
    taps = taps.astype(jnp.bfloat16)

    tile_k = _k_tile(k_pad)
    kernel = functools.partial(_fused_conv_kernel, pre_act=pre_act, out_relu=out_relu)
    out = pl.pallas_call(
        kernel,
        grid=(rows_pad // tile_m, k_pad // tile_k),
        in_specs=[
            pl.BlockSpec((tile_m, tile_k), lambda i, k: (i, k)),
            pl.BlockSpec((tile_k, CPAD), lambda i, k: (k, 0)),
            pl.BlockSpec((1, tile_k), lambda i, k: (0, k)),
            pl.BlockSpec((1, tile_k), lambda i, k: (0, k)),
            pl.BlockSpec((1, CPAD), lambda i, k: (0, 0)),
        ],
        out_specs=pl.BlockSpec((tile_m, CPAD), lambda i, k: (i, 0)),
        out_shape=jax.ShapeDtypeStruct((rows_pad, CPAD), jnp.bfloat16),
        scratch_shapes=[pltpu.VMEM((tile_m, CPAD), jnp.float32)],
        compiler_params=pltpu.CompilerParams(
            dimension_semantics=("parallel", "arbitrary"),
            vmem_limit_bytes=_VMEM_LIMIT),
    )(taps, w_p, in_scale_p, in_shift_p, out_shift_p)

    return out[:rows].reshape(n, ho, wo, CPAD), cout


# ---------------------------------------------------------------------------
# Pooling: tap index as trailing "arbitrary" grid axis with running max/sum
# in a f32 VMEM scratch; bf16 in / bf16 out, lane-dense at 128 channels.
# ---------------------------------------------------------------------------
def _pool_kernel(taps_ref, o_ref, acc_ref, *, op, inv_count):
    k = pl.program_id(1)

    @pl.when(k == 0)
    def _init():
        acc_ref[...] = jnp.full_like(acc_ref, -1e30 if op == "max" else 0.0)

    v = taps_ref[...].astype(jnp.float32)
    if op == "max":
        acc_ref[...] = jnp.maximum(acc_ref[...], v)
    else:
        acc_ref[...] = acc_ref[...] + v

    @pl.when(k == pl.num_programs(1) - 1)
    def _finalize():
        r = acc_ref[...]
        if op == "avg":
            r = r * inv_count
        o_ref[...] = r.astype(o_ref.dtype)


def pool2d(x_pad, k, stride, pad, op):
    # NOTE: avg-pool with pad>0 would include padded zeros in the mean
    # (count_include_pad); not triggered by the 2x2/stride-2/pad-0 transition pool.
    n, h, w, c = x_pad.shape
    # Large *finite* negative fill for maxpool: no -inf can ever reach a later
    # conv (which would turn into NaN via -inf * 0-weight).
    fill = -1e30 if op == "max" else 0.0
    xp = jnp.pad(x_pad, ((0, 0), (pad, pad), (pad, pad), (0, 0)), constant_values=fill)
    ho = (h + 2 * pad - k) // stride + 1
    wo = (w + 2 * pad - k) // stride + 1
    rows = n * ho * wo
    rows_pad, tile_m = _tile_rows(rows)
    views = []
    for i in range(k):
        for j in range(k):
            v = xp[:, i:i + stride * ho:stride,
                   j:j + stride * wo:stride, :].reshape(rows, c)
            if rows_pad != rows:
                v = jnp.pad(v, ((0, rows_pad - rows), (0, 0)))
            views.append(v)
    taps = jnp.stack(views, axis=0)                      # [KK, rows_pad, C] bf16
    kk = k * k
    kernel = functools.partial(_pool_kernel, op=op, inv_count=1.0 / kk)
    out = pl.pallas_call(
        kernel,
        grid=(rows_pad // tile_m, kk),
        in_specs=[pl.BlockSpec((None, tile_m, c), lambda i, t: (t, i, 0))],
        out_specs=pl.BlockSpec((tile_m, c), lambda i, t: (i, 0)),
        out_shape=jax.ShapeDtypeStruct((rows_pad, c), x_pad.dtype),
        scratch_shapes=[pltpu.VMEM((tile_m, c), jnp.float32)],
        compiler_params=pltpu.CompilerParams(
            dimension_semantics=("parallel", "arbitrary"),
            vmem_limit_bytes=_VMEM_LIMIT),
    )(taps)
    return out[:rows].reshape(n, ho, wo, c)


# ---------------------------------------------------------------------------
# Fused head: final BN + ReLU + global-average-pool + Linear (cls and logits),
# tiled over batch ("parallel") instead of a single whole-map block.
# TODO(synk): for very large HW, add an HW reduction grid axis with a
# running-sum scratch instead of loading the full HW slab per batch tile.
# ---------------------------------------------------------------------------
def _head_kernel(x_ref, scale_ref, shift_ref, wh_ref, bh_ref, cls_ref, logit_ref,
                 *, inv_hw):
    y = jnp.maximum(x_ref[...].astype(jnp.float32) * scale_ref[...]
                    + shift_ref[...], 0.0)               # [tile_n, HW, C] f32
    cls = jnp.sum(y, axis=1) * inv_hw                    # [tile_n, C]
    cls_ref[...] = cls
    logit_ref[...] = jnp.dot(cls.astype(jnp.bfloat16), wh_ref[...],
                             preferred_element_type=jnp.float32) + bh_ref[...]


def head_forward(x_pad, c_real, final_bn, head_w, head_b, eps=1e-5):
    n, h, w, cpad = x_pad.shape
    hw = h * w
    tile_n = 8
    nb = _round_up(n, tile_n)
    x3 = x_pad.reshape(n, hw, cpad)                      # bf16
    if nb != n:
        x3 = jnp.pad(x3, ((0, nb - n), (0, 0), (0, 0)))
    s = final_bn["gamma"] / jnp.sqrt(final_bn["var"] + eps)
    sh = final_bn["beta"] - final_bn["mean"] * s
    scale = _pad_last(s[None, None, :], cpad)            # [1,1,CPAD] f32
    shift = _pad_last(sh[None, None, :], cpad)
    nc = head_w.shape[1]
    wh = jnp.zeros((cpad, NCPAD), jnp.float32).at[:c_real, :nc].set(head_w)
    wh = wh.astype(jnp.bfloat16)
    bh = _pad_last(head_b, NCPAD)                        # [1, NCPAD] f32

    kernel = functools.partial(_head_kernel, inv_hw=1.0 / hw)
    cls_pad, logits_pad = pl.pallas_call(
        kernel,
        grid=(nb // tile_n,),
        in_specs=[
            pl.BlockSpec((tile_n, hw, cpad), lambda b: (b, 0, 0)),
            pl.BlockSpec((1, 1, cpad), lambda b: (0, 0, 0)),
            pl.BlockSpec((1, 1, cpad), lambda b: (0, 0, 0)),
            pl.BlockSpec((cpad, NCPAD), lambda b: (0, 0)),
            pl.BlockSpec((1, NCPAD), lambda b: (0, 0)),
        ],
        out_specs=(pl.BlockSpec((tile_n, cpad), lambda b: (b, 0)),
                   pl.BlockSpec((tile_n, NCPAD), lambda b: (b, 0))),
        out_shape=(jax.ShapeDtypeStruct((nb, cpad), jnp.float32),
                   jax.ShapeDtypeStruct((nb, NCPAD), jnp.float32)),
        compiler_params=pltpu.CompilerParams(
            dimension_semantics=("parallel",),
            vmem_limit_bytes=_VMEM_LIMIT),
    )(x3, scale, shift, wh, bh)
    return cls_pad[:n, :c_real], logits_pad[:n, :nc]


# ---------------------------------------------------------------------------
# Deterministic synthetic parameters (DenseNet-style backbone + linear head)
# ---------------------------------------------------------------------------
def make_params(key):
    ks = iter(jax.random.split(key, 64))

    def nrm(shape, scale=0.1):
        return scale * jax.random.normal(next(ks), shape, dtype=jnp.float32)

    def bn(c):
        return {
            "gamma": 1.0 + nrm((c,)),
            "beta": nrm((c,)),
            "mean": nrm((c,)),
            "var": 1.0 + 0.1 * jnp.abs(
                jax.random.normal(next(ks), (c,), jnp.float32)),
        }

    growth, bottleneck, init_feat = 8, 16, 16
    params = {
        "stem_conv": nrm((7, 7, 3, init_feat)),   # 7x7/2, bias=False
        "stem_bn": bn(init_feat),
        "block": [],
    }
    c = init_feat
    for _ in range(2):  # scaled-down dense block (real model: 6/12/36/24 layers)
        params["block"].append({
            "bn1": bn(c),
            "conv1": nrm((1, 1, c, bottleneck)),
            "bn2": bn(bottleneck),
            "conv2": nrm((3, 3, bottleneck, growth)),
        })
        c += growth
    params["trans_bn"] = bn(c)
    trans_out = c // 2
    params["trans_conv"] = nrm((1, 1, c, trans_out))
    params["final_bn"] = bn(trans_out)
    num_classes = 2  # PCam classifier head
    params["head_w"] = nrm((trans_out, num_classes))
    params["head_b"] = nrm((1, num_classes))
    return params


# ---------------------------------------------------------------------------
# Forward pass (semantics of PretrainedResnet50.forward)
# ---------------------------------------------------------------------------
def pretrained_resnet50_forward(params, x_nchw, output_cls=False):
    # ---- layers_before_last_linear: conv features + global pool -> cls ----
    x = jnp.transpose(x_nchw, (0, 2, 3, 1)).astype(jnp.float32)   # NCHW -> NHWC
    x = _pad_last(x, CPAD).astype(jnp.bfloat16)                   # lane-pad, bf16

    # stem: conv(7x7/2) + folded BN + ReLU  -> maxpool 3x3/2
    x, c = fused_conv(x, 3, params["stem_conv"], stride=2, pad=3,
                      post_bn=params["stem_bn"], out_relu=True)
    x = pool2d(x, 3, 2, 1, "max")

    # dense block: each layer = [BN1+ReLU -> 1x1 conv -> BN2+ReLU] (one kernel)
    #              then        [3x3 conv]                          (one kernel)
    for lyr in params["block"]:
        h, ch = fused_conv(x, c, lyr["conv1"], stride=1, pad=0,
                           pre_bn=lyr["bn1"], post_bn=lyr["bn2"], out_relu=True)
        h, ch = fused_conv(h, ch, lyr["conv2"], stride=1, pad=1)
        x = _pad_last(jnp.concatenate([x[..., :c], h[..., :ch]], axis=-1), CPAD)
        c = c + ch

    # transition: BN+ReLU -> 1x1 conv (one kernel) -> avgpool 2x2/2
    x, c = fused_conv(x, c, params["trans_conv"], stride=1, pad=0,
                      pre_bn=params["trans_bn"])
    x = pool2d(x, 2, 2, 0, "avg")

    # fused head: final BN + ReLU + global avg pool + Linear (one kernel)
    cls, logits = head_forward(x, c, params["final_bn"],
                               params["head_w"], params["head_b"])
    if output_cls:
        return cls
    return logits


if __name__ == "__main__":
    key = jax.random.PRNGKey(0)
    pkey, xkey = jax.random.split(key)
    params = make_params(pkey)
    x = jax.random.normal(xkey, (2, 3, 16, 16), dtype=jnp.float32)  # NCHW input
    fwd = jax.jit(pretrained_resnet50_forward, static_argnames=("output_cls",))
    logits = fwd(params, x, output_cls=False)
    cls = fwd(params, x, output_cls=True)
    jax.block_until_ready((logits, cls))
    assert logits.shape == (2, 2)
    assert cls.shape == (2, 16)
    print("KERNEL_OK")
</pallas_src>

<mosaic_0001>
module attributes {stable_mosaic.version = 11 : i64} {
  func.func @_fused_conv_kernel(%arg0: i32, %arg1: i32, %arg2: memref<64x256xbf16, #tpu.memory_space<vmem>>, %arg3: memref<256x128xbf16, #tpu.memory_space<vmem>>, %arg4: memref<1x256xf32, #tpu.memory_space<vmem>>, %arg5: memref<1x256xf32, #tpu.memory_space<vmem>>, %arg6: memref<1x128xf32, #tpu.memory_space<vmem>>, %arg7: memref<64x128xbf16, #tpu.memory_space<vmem>>, %arg8: memref<64x128xf32, #tpu.memory_space<vmem>>) attributes {dimension_semantics = [#tpu.dimension_semantics<parallel>, #tpu.dimension_semantics<arbitrary>], iteration_bounds = array<i64: 2, 1>, scalar_prefetch = 0 : i64, scratch_operands = 1 : i64, tpu.core_type = #tpu.core_type<tc>, window_params = [{transform_indices = @transform_0, window_bounds = array<i64: 64, 256>}, {transform_indices = @transform_1, window_bounds = array<i64: 256, 128>}, {transform_indices = @transform_2, window_bounds = array<i64: 1, 256>}, {transform_indices = @transform_3, window_bounds = array<i64: 1, 256>}, {pipeline_mode = #tpu.pipeline_mode<synchronous>, transform_indices = @transform_4, window_bounds = array<i64: 1, 128>}, {transform_indices = @transform_5, window_bounds = array<i64: 64, 128>}]} {
    %c0_i32 = arith.constant 0 : i32
    %0 = arith.cmpi eq, %arg1, %c0_i32 : i32
    %1 = arith.extui %0 : i1 to i32
    %c0_i32_0 = arith.constant 0 : i32
    %2 = arith.cmpi ne, %1, %c0_i32_0 : i32
    scf.if %2 {
      %cst_10 = arith.constant 0.000000e+00 : f32
      %12 = vector.broadcast %cst_10 : f32 to vector<64x128xf32>
      %c0_11 = arith.constant 0 : index
      %c0_12 = arith.constant 0 : index
      %13 = vector.load %arg8[%c0_11, %c0_12] : memref<64x128xf32, #tpu.memory_space<vmem>>, vector<64x128xf32>
      tpu.vector_store %arg8[%c0_11, %c0_12], %12 {strides = array<i32>} : memref<64x128xf32, #tpu.memory_space<vmem>>, vector<64x128xf32>,
    } else {
    }
    %c0 = arith.constant 0 : index
    %c0_1 = arith.constant 0 : index
    %3 = vector.load %arg2[%c0, %c0_1] : memref<64x256xbf16, #tpu.memory_space<vmem>>, vector<64x256xbf16>
    %c0_2 = arith.constant 0 : index
    %c0_3 = arith.constant 0 : index
    %4 = vector.load %arg8[%c0_2, %c0_3] : memref<64x128xf32, #tpu.memory_space<vmem>>, vector<64x128xf32>
    %c0_4 = arith.constant 0 : index
    %c0_5 = arith.constant 0 : index
    %5 = vector.load %arg3[%c0_4, %c0_5] : memref<256x128xbf16, #tpu.memory_space<vmem>>, vector<256x128xbf16>
    %cst = arith.constant dense<0.000000e+00> : vector<64x128xf32>
    %6 = tpu.matmul %3, %5, %cst {dimension_numbers = #tpu.dot_dimension_numbers<[1], [0], [0], [1], [0, 0, 1, 1], [], []>} : vector<64x256xbf16>, vector<256x128xbf16>, vector<64x128xf32> -> vector<64x128xf32>
    %7 = arith.addf %4, %6 : vector<64x128xf32>
    %c0_6 = arith.constant 0 : index
    %c0_7 = arith.constant 0 : index
    %8 = vector.load %arg8[%c0_6, %c0_7] : memref<64x128xf32, #tpu.memory_space<vmem>>, vector<64x128xf32>
    tpu.vector_store %arg8[%c0_6, %c0_7], %7 {strides = array<i32>} : memref<64x128xf32, #tpu.memory_space<vmem>>, vector<64x128xf32>,
    %c0_i32_8 = arith.constant 0 : i32
    %9 = arith.cmpi eq, %arg1, %c0_i32_8 : i32
    %10 = arith.extui %9 : i1 to i32
    %c0_i32_9 = arith.constant 0 : i32
    %11 = arith.cmpi ne, %10, %c0_i32_9 : i32
    scf.if %11 {
      %c0_10 = arith.constant 0 : index
      %c0_11 = arith.constant 0 : index
      %12 = vector.load %arg8[%c0_10, %c0_11] : memref<64x128xf32, #tpu.memory_space<vmem>>, vector<64x128xf32>
      %c0_12 = arith.constant 0 : index
      %c0_13 = arith.constant 0 : index
      %13 = vector.load %arg6[%c0_12, %c0_13] : memref<1x128xf32, #tpu.memory_space<vmem>>, vector<1x128xf32>
      %14 = vector.broadcast %13 : vector<1x128xf32> to vector<64x128xf32>
      %15 = arith.addf %12, %14 : vector<64x128xf32>
      %cst_14 = arith.constant 0.000000e+00 : f32
      %16 = vector.broadcast %cst_14 : f32 to vector<64x128xf32>
      %17 = arith.maximumf %15, %16 : vector<64x128xf32>
      %18 = arith.truncf %17 : vector<64x128xf32> to vector<64x128xbf16>
      %c0_15 = arith.constant 0 : index
      %c0_16 = arith.constant 0 : index
      %19 = vector.load %arg7[%c0_15, %c0_16] : memref<64x128xbf16, #tpu.memory_space<vmem>>, vector<64x128xbf16>
      tpu.vector_store %arg7[%c0_15, %c0_16], %18 {strides = array<i32>} : memref<64x128xbf16, #tpu.memory_space<vmem>>, vector<64x128xbf16>,
    } else {
    }
    return
  }
  func.func @transform_0(%arg0: i32, %arg1: i32) -> (i32, i32) {
    %c0_i32 = arith.constant 0 : i32
    return %arg0, %arg1 : i32, i32
  }
  func.func @transform_1(%arg0: i32, %arg1: i32) -> (i32, i32) {
    %c0_i32 = arith.constant 0 : i32
    %c0_i32_0 = arith.constant 0 : i32
    return %arg1, %c0_i32 : i32, i32
  }
  func.func @transform_2(%arg0: i32, %arg1: i32) -> (i32, i32) {
    %c0_i32 = arith.constant 0 : i32
    %c0_i32_0 = arith.constant 0 : i32
    return %c0_i32, %arg1 : i32, i32
  }
  func.func @transform_3(%arg0: i32, %arg1: i32) -> (i32, i32) {
    %c0_i32 = arith.constant 0 : i32
    %c0_i32_0 = arith.constant 0 : i32
    return %c0_i32, %arg1 : i32, i32
  }
  func.func @transform_4(%arg0: i32, %arg1: i32) -> (i32, i32) {
    %c0_i32 = arith.constant 0 : i32
    %c0_i32_0 = arith.constant 0 : i32
    %c0_i32_1 = arith.constant 0 : i32
    return %c0_i32, %c0_i32_0 : i32, i32
  }
  func.func @transform_5(%arg0: i32, %arg1: i32) -> (i32, i32) {
    %c0_i32 = arith.constant 0 : i32
    %c0_i32_0 = arith.constant 0 : i32
    return %arg0, %c0_i32 : i32, i32
  }
}

module attributes {stable_mosaic.version = 11 : i64} {
  func.func @_pool_kernel(%arg0: i32, %arg1: i32, %arg2: memref<1x16x128xbf16, #tpu.memory_space<vmem>>, %arg3: memref<16x128xbf16, #tpu.memory_space<vmem>>, %arg4: memref<16x128xf32, #tpu.memory_space<vmem>>) attributes {dimension_semantics = [#tpu.dimension_semantics<parallel>, #tpu.dimension_semantics<arbitrary>], iteration_bounds = array<i64: 2, 9>, scalar_prefetch = 0 : i64, scratch_operands = 1 : i64, tpu.core_type = #tpu.core_type<tc>, window_params = [{transform_indices = @transform_0, window_bounds = array<i64: 1, 16, 128>}, {transform_indices = @transform_1, window_bounds = array<i64: 16, 128>}]} {
    %c0_i32 = arith.constant 0 : i32
    %0 = arith.cmpi eq, %arg1, %c0_i32 : i32
    %1 = arith.extui %0 : i1 to i32
    %c0_i32_0 = arith.constant 0 : i32
    %2 = arith.cmpi ne, %1, %c0_i32_0 : i32
    scf.if %2 {
      %cst = arith.constant -1.000000e+30 : f32
      %12 = vector.broadcast %cst : f32 to vector<16x128xf32>
      %c0_8 = arith.constant 0 : index
      %c0_9 = arith.constant 0 : index
      %13 = vector.load %arg4[%c0_8, %c0_9] : memref<16x128xf32, #tpu.memory_space<vmem>>, vector<16x128xf32>
      tpu.vector_store %arg4[%c0_8, %c0_9], %12 {strides = array<i32>} : memref<16x128xf32, #tpu.memory_space<vmem>>, vector<16x128xf32>,
    } else {
    }
    %c0 = arith.constant 0 : index
    %c0_1 = arith.constant 0 : index
    %c0_2 = arith.constant 0 : index
    %3 = vector.load %arg2[%c0, %c0_1, %c0_2] : memref<1x16x128xbf16, #tpu.memory_space<vmem>>, vector<1x16x128xbf16>
    %4 = vector.shape_cast %3 : vector<1x16x128xbf16> to vector<16x128xbf16>
    %5 = arith.extf %4 : vector<16x128xbf16> to vector<16x128xf32>
    %c0_3 = arith.constant 0 : index
    %c0_4 = arith.constant 0 : index
    %6 = vector.load %arg4[%c0_3, %c0_4] : memref<16x128xf32, #tpu.memory_space<vmem>>, vector<16x128xf32>
    %7 = arith.maximumf %6, %5 : vector<16x128xf32>
    %c0_5 = arith.constant 0 : index
    %c0_6 = arith.constant 0 : index
    %8 = vector.load %arg4[%c0_5, %c0_6] : memref<16x128xf32, #tpu.memory_space<vmem>>, vector<16x128xf32>
    tpu.vector_store %arg4[%c0_5, %c0_6], %7 {strides = array<i32>} : memref<16x128xf32, #tpu.memory_space<vmem>>, vector<16x128xf32>,
    %c8_i32 = arith.constant 8 : i32
    %9 = arith.cmpi eq, %arg1, %c8_i32 : i32
    %10 = arith.extui %9 : i1 to i32
    %c0_i32_7 = arith.constant 0 : i32
    %11 = arith.cmpi ne, %10, %c0_i32_7 : i32
    scf.if %11 {
      %c0_8 = arith.constant 0 : index
      %c0_9 = arith.constant 0 : index
      %12 = vector.load %arg4[%c0_8, %c0_9] : memref<16x128xf32, #tpu.memory_space<vmem>>, vector<16x128xf32>
      %13 = arith.truncf %12 : vector<16x128xf32> to vector<16x128xbf16>
      %c0_10 = arith.constant 0 : index
      %c0_11 = arith.constant 0 : index
      %14 = vector.load %arg3[%c0_10, %c0_11] : memref<16x128xbf16, #tpu.memory_space<vmem>>, vector<16x128xbf16>
      tpu.vector_store %arg3[%c0_10, %c0_11], %13 {strides = array<i32>} : memref<16x128xbf16, #tpu.memory_space<vmem>>, vector<16x128xbf16>,
    } else {
    }
    return
  }
  func.func @transform_0(%arg0: i32, %arg1: i32) -> (i32, i32, i32) {
    %c0_i32 = arith.constant 0 : i32
    %c0_i32_0 = arith.constant 0 : i32
    return %arg1, %arg0, %c0_i32 : i32, i32, i32
  }
  func.func @transform_1(%arg0: i32, %arg1: i32) -> (i32, i32) {
    %c0_i32 = arith.constant 0 : i32
    %c0_i32_0 = arith.constant 0 : i32
    return %arg0, %c0_i32 : i32, i32
  }
}

module attributes {stable_mosaic.version = 11 : i64} {
  func.func @_fused_conv_kernel(%arg0: i32, %arg1: i32, %arg2: memref<16x128xbf16, #tpu.memory_space<vmem>>, %arg3: memref<128x128xbf16, #tpu.memory_space<vmem>>, %arg4: memref<1x128xf32, #tpu.memory_space<vmem>>, %arg5: memref<1x128xf32, #tpu.memory_space<vmem>>, %arg6: memref<1x128xf32, #tpu.memory_space<vmem>>, %arg7: memref<16x128xbf16, #tpu.memory_space<vmem>>, %arg8: memref<16x128xf32, #tpu.memory_space<vmem>>) attributes {dimension_semantics = [#tpu.dimension_semantics<parallel>, #tpu.dimension_semantics<arbitrary>], iteration_bounds = array<i64: 2, 1>, scalar_prefetch = 0 : i64, scratch_operands = 1 : i64, tpu.core_type = #tpu.core_type<tc>, window_params = [{transform_indices = @transform_0, window_bounds = array<i64: 16, 128>}, {transform_indices = @transform_1, window_bounds = array<i64: 128, 128>}, {transform_indices = @transform_2, window_bounds = array<i64: 1, 128>}, {transform_indices = @transform_3, window_bounds = array<i64: 1, 128>}, {pipeline_mode = #tpu.pipeline_mode<synchronous>, transform_indices = @transform_4, window_bounds = array<i64: 1, 128>}, {transform_indices = @transform_5, window_bounds = array<i64: 16, 128>}]} {
    %c0_i32 = arith.constant 0 : i32
    %0 = arith.cmpi eq, %arg1, %c0_i32 : i32
    %1 = arith.extui %0 : i1 to i32
    %c0_i32_0 = arith.constant 0 : i32
    %2 = arith.cmpi ne, %1, %c0_i32_0 : i32
    scf.if %2 {
      %cst_15 = arith.constant 0.000000e+00 : f32
      %22 = vector.broadcast %cst_15 : f32 to vector<16x128xf32>
      %c0_16 = arith.constant 0 : index
      %c0_17 = arith.constant 0 : index
      %23 = vector.load %arg8[%c0_16, %c0_17] : memref<16x128xf32, #tpu.memory_space<vmem>>, vector<16x128xf32>
      tpu.vector_store %arg8[%c0_16, %c0_17], %22 {strides = array<i32>} : memref<16x128xf32, #tpu.memory_space<vmem>>, vector<16x128xf32>,
    } else {
    }
    %c0 = arith.constant 0 : index
    %c0_1 = arith.constant 0 : index
    %3 = vector.load %arg2[%c0, %c0_1] : memref<16x128xbf16, #tpu.memory_space<vmem>>, vector<16x128xbf16>
    %4 = arith.extf %3 : vector<16x128xbf16> to vector<16x128xf32>
    %c0_2 = arith.constant 0 : index
    %c0_3 = arith.constant 0 : index
    %5 = vector.load %arg4[%c0_2, %c0_3] : memref<1x128xf32, #tpu.memory_space<vmem>>, vector<1x128xf32>
    %6 = vector.broadcast %5 : vector<1x128xf32> to vector<16x128xf32>
    %7 = arith.mulf %4, %6 : vector<16x128xf32>
    %c0_4 = arith.constant 0 : index
    %c0_5 = arith.constant 0 : index
    %8 = vector.load %arg5[%c0_4, %c0_5] : memref<1x128xf32, #tpu.memory_space<vmem>>, vector<1x128xf32>
    %9 = vector.broadcast %8 : vector<1x128xf32> to vector<16x128xf32>
    %10 = arith.addf %7, %9 : vector<16x128xf32>
    %cst = arith.constant 0.000000e+00 : f32
    %11 = vector.broadcast %cst : f32 to vector<16x128xf32>
    %12 = arith.maximumf %10, %11 : vector<16x128xf32>
    %13 = arith.truncf %12 : vector<16x128xf32> to vector<16x128xbf16>
    %c0_6 = arith.constant 0 : index
    %c0_7 = arith.constant 0 : index
    %14 = vector.load %arg8[%c0_6, %c0_7] : memref<16x128xf32, #tpu.memory_space<vmem>>, vector<16x128xf32>
    %c0_8 = arith.constant 0 : index
    %c0_9 = arith.constant 0 : index
    %15 = vector.load %arg3[%c0_8, %c0_9] : memref<128x128xbf16, #tpu.memory_space<vmem>>, vector<128x128xbf16>
    %cst_10 = arith.constant dense<0.000000e+00> : vector<16x128xf32>
    %16 = tpu.matmul %13, %15, %cst_10 {dimension_numbers = #tpu.dot_dimension_numbers<[1], [0], [0], [1], [0, 0, 1, 1], [], []>} : vector<16x128xbf16>, vector<128x128xbf16>, vector<16x128xf32> -> vector<16x128xf32>
    %17 = arith.addf %14, %16 : vector<16x128xf32>
    %c0_11 = arith.constant 0 : index
    %c0_12 = arith.constant 0 : index
    %18 = vector.load %arg8[%c0_11, %c0_12] : memref<16x128xf32, #tpu.memory_space<vmem>>, vector<16x128xf32>
    tpu.vector_store %arg8[%c0_11, %c0_12], %17 {strides = array<i32>} : memref<16x128xf32, #tpu.memory_space<vmem>>, vector<16x128xf32>,
    %c0_i32_13 = arith.constant 0 : i32
    %19 = arith.cmpi eq, %arg1, %c0_i32_13 : i32
    %20 = arith.extui %19 : i1 to i32
    %c0_i32_14 = arith.constant 0 : i32
    %21 = arith.cmpi ne, %20, %c0_i32_14 : i32
    scf.if %21 {
      %c0_15 = arith.constant 0 : index
      %c0_16 = arith.constant 0 : index
      %22 = vector.load %arg8[%c0_15, %c0_16] : memref<16x128xf32, #tpu.memory_space<vmem>>, vector<16x128xf32>
      %c0_17 = arith.constant 0 : index
      %c0_18 = arith.constant 0 : index
      %23 = vector.load %arg6[%c0_17, %c0_18] : memref<1x128xf32, #tpu.memory_space<vmem>>, vector<1x128xf32>
      %24 = vector.broadcast %23 : vector<1x128xf32> to vector<16x128xf32>
      %25 = arith.addf %22, %24 : vector<16x128xf32>
      %cst_19 = arith.constant 0.000000e+00 : f32
      %26 = vector.broadcast %cst_19 : f32 to vector<16x128xf32>
      %27 = arith.maximumf %25, %26 : vector<16x128xf32>
      %28 = arith.truncf %27 : vector<16x128xf32> to vector<16x128xbf16>
      %c0_20 = arith.constant 0 : index
      %c0_21 = arith.constant 0 : index
      %29 = vector.load %arg7[%c0_20, %c0_21] : memref<16x128xbf16, #tpu.memory_space<vmem>>, vector<16x128xbf16>
      tpu.vector_store %arg7[%c0_20, %c0_21], %28 {strides = array<i32>} : memref<16x128xbf16, #tpu.memory_space<vmem>>, vector<16x128xbf16>,
    } else {
    }
    return
  }
  func.func @transform_0(%arg0: i32, %arg1: i32) -> (i32, i32) {
    %c0_i32 = arith.constant 0 : i32
    return %arg0, %arg1 : i32, i32
  }
  func.func @transform_1(%arg0: i32, %arg1: i32) -> (i32, i32) {
    %c0_i32 = arith.constant 0 : i32
    %c0_i32_0 = arith.constant 0 : i32
    return %arg1, %c0_i32 : i32, i32
  }
  func.func @transform_2(%arg0: i32, %arg1: i32) -> (i32, i32) {
    %c0_i32 = arith.constant 0 : i32
    %c0_i32_0 = arith.constant 0 : i32
    return %c0_i32, %arg1 : i32, i32
  }
  func.func @transform_3(%arg0: i32, %arg1: i32) -> (i32, i32) {
    %c0_i32 = arith.constant 0 : i32
    %c0_i32_0 = arith.constant 0 : i32
    return %c0_i32, %arg1 : i32, i32
  }
  func.func @transform_4(%arg0: i32, %arg1: i32) -> (i32, i32) {
    %c0_i32 = arith.constant 0 : i32
    %c0_i32_0 = arith.constant 0 : i32
    %c0_i32_1 = arith.constant 0 : i32
    return %c0_i32, %c0_i32_0 : i32, i32
  }
  func.func @transform_5(%arg0: i32, %arg1: i32) -> (i32, i32) {
    %c0_i32 = arith.constant 0 : i32
    %c0_i32_0 = arith.constant 0 : i32
    return %arg0, %c0_i32 : i32, i32
  }
}

module attributes {stable_mosaic.version = 11 : i64} {
  func.func @_fused_conv_kernel(%arg0: i32, %arg1: i32, %arg2: memref<16x256xbf16, #tpu.memory_space<vmem>>, %arg3: memref<256x128xbf16, #tpu.memory_space<vmem>>, %arg4: memref<1x256xf32, #tpu.memory_space<vmem>>, %arg5: memref<1x256xf32, #tpu.memory_space<vmem>>, %arg6: memref<1x128xf32, #tpu.memory_space<vmem>>, %arg7: memref<16x128xbf16, #tpu.memory_space<vmem>>, %arg8: memref<16x128xf32, #tpu.memory_space<vmem>>) attributes {dimension_semantics = [#tpu.dimension_semantics<parallel>, #tpu.dimension_semantics<arbitrary>], iteration_bounds = array<i64: 2, 1>, scalar_prefetch = 0 : i64, scratch_operands = 1 : i64, tpu.core_type = #tpu.core_type<tc>, window_params = [{transform_indices = @transform_0, window_bounds = array<i64: 16, 256>}, {transform_indices = @transform_1, window_bounds = array<i64: 256, 128>}, {transform_indices = @transform_2, window_bounds = array<i64: 1, 256>}, {transform_indices = @transform_3, window_bounds = array<i64: 1, 256>}, {pipeline_mode = #tpu.pipeline_mode<synchronous>, transform_indices = @transform_4, window_bounds = array<i64: 1, 128>}, {transform_indices = @transform_5, window_bounds = array<i64: 16, 128>}]} {
    %c0_i32 = arith.constant 0 : i32
    %0 = arith.cmpi eq, %arg1, %c0_i32 : i32
    %1 = arith.extui %0 : i1 to i32
    %c0_i32_0 = arith.constant 0 : i32
    %2 = arith.cmpi ne, %1, %c0_i32_0 : i32
    scf.if %2 {
      %cst_10 = arith.constant 0.000000e+00 : f32
      %12 = vector.broadcast %cst_10 : f32 to vector<16x128xf32>
      %c0_11 = arith.constant 0 : index
      %c0_12 = arith.constant 0 : index
      %13 = vector.load %arg8[%c0_11, %c0_12] : memref<16x128xf32, #tpu.memory_space<vmem>>, vector<16x128xf32>
      tpu.vector_store %arg8[%c0_11, %c0_12], %12 {strides = array<i32>} : memref<16x128xf32, #tpu.memory_space<vmem>>, vector<16x128xf32>,
    } else {
    }
    %c0 = arith.constant 0 : index
    %c0_1 = arith.constant 0 : index
    %3 = vector.load %arg2[%c0, %c0_1] : memref<16x256xbf16, #tpu.memory_space<vmem>>, vector<16x256xbf16>
    %c0_2 = arith.constant 0 : index
    %c0_3 = arith.constant 0 : index
    %4 = vector.load %arg8[%c0_2, %c0_3] : memref<16x128xf32, #tpu.memory_space<vmem>>, vector<16x128xf32>
    %c0_4 = arith.constant 0 : index
    %c0_5 = arith.constant 0 : index
    %5 = vector.load %arg3[%c0_4, %c0_5] : memref<256x128xbf16, #tpu.memory_space<vmem>>, vector<256x128xbf16>
    %cst = arith.constant dense<0.000000e+00> : vector<16x128xf32>
    %6 = tpu.matmul %3, %5, %cst {dimension_numbers = #tpu.dot_dimension_numbers<[1], [0], [0], [1], [0, 0, 1, 1], [], []>} : vector<16x256xbf16>, vector<256x128xbf16>, vector<16x128xf32> -> vector<16x128xf32>
    %7 = arith.addf %4, %6 : vector<16x128xf32>
    %c0_6 = arith.constant 0 : index
    %c0_7 = arith.constant 0 : index
    %8 = vector.load %arg8[%c0_6, %c0_7] : memref<16x128xf32, #tpu.memory_space<vmem>>, vector<16x128xf32>
    tpu.vector_store %arg8[%c0_6, %c0_7], %7 {strides = array<i32>} : memref<16x128xf32, #tpu.memory_space<vmem>>, vector<16x128xf32>,
    %c0_i32_8 = arith.constant 0 : i32
    %9 = arith.cmpi eq, %arg1, %c0_i32_8 : i32
    %10 = arith.extui %9 : i1 to i32
    %c0_i32_9 = arith.constant 0 : i32
    %11 = arith.cmpi ne, %10, %c0_i32_9 : i32
    scf.if %11 {
      %c0_10 = arith.constant 0 : index
      %c0_11 = arith.constant 0 : index
      %12 = vector.load %arg8[%c0_10, %c0_11] : memref<16x128xf32, #tpu.memory_space<vmem>>, vector<16x128xf32>
      %c0_12 = arith.constant 0 : index
      %c0_13 = arith.constant 0 : index
      %13 = vector.load %arg6[%c0_12, %c0_13] : memref<1x128xf32, #tpu.memory_space<vmem>>, vector<1x128xf32>
      %14 = vector.broadcast %13 : vector<1x128xf32> to vector<16x128xf32>
      %15 = arith.addf %12, %14 : vector<16x128xf32>
      %16 = arith.truncf %15 : vector<16x128xf32> to vector<16x128xbf16>
      %c0_14 = arith.constant 0 : index
      %c0_15 = arith.constant 0 : index
      %17 = vector.load %arg7[%c0_14, %c0_15] : memref<16x128xbf16, #tpu.memory_space<vmem>>, vector<16x128xbf16>
      tpu.vector_store %arg7[%c0_14, %c0_15], %16 {strides = array<i32>} : memref<16x128xbf16, #tpu.memory_space<vmem>>, vector<16x128xbf16>,
    } else {
    }
    return
  }
  func.func @transform_0(%arg0: i32, %arg1: i32) -> (i32, i32) {
    %c0_i32 = arith.constant 0 : i32
    return %arg0, %arg1 : i32, i32
  }
  func.func @transform_1(%arg0: i32, %arg1: i32) -> (i32, i32) {
    %c0_i32 = arith.constant 0 : i32
    %c0_i32_0 = arith.constant 0 : i32
    return %arg1, %c0_i32 : i32, i32
  }
  func.func @transform_2(%arg0: i32, %arg1: i32) -> (i32, i32) {
    %c0_i32 = arith.constant 0 : i32
    %c0_i32_0 = arith.constant 0 : i32
    return %c0_i32, %arg1 : i32, i32
  }
  func.func @transform_3(%arg0: i32, %arg1: i32) -> (i32, i32) {
    %c0_i32 = arith.constant 0 : i32
    %c0_i32_0 = arith.constant 0 : i32
    return %c0_i32, %arg1 : i32, i32
  }
  func.func @transform_4(%arg0: i32, %arg1: i32) -> (i32, i32) {
    %c0_i32 = arith.constant 0 : i32
    %c0_i32_0 = arith.constant 0 : i32
    %c0_i32_1 = arith.constant 0 : i32
    return %c0_i32, %c0_i32_0 : i32, i32
  }
  func.func @transform_5(%arg0: i32, %arg1: i32) -> (i32, i32) {
    %c0_i32 = arith.constant 0 : i32
    %c0_i32_0 = arith.constant 0 : i32
    return %arg0, %c0_i32 : i32, i32
  }
}

module attributes {stable_mosaic.version = 11 : i64} {
  func.func @_fused_conv_kernel(%arg0: i32, %arg1: i32, %arg2: memref<16x128xbf16, #tpu.memory_space<vmem>>, %arg3: memref<128x128xbf16, #tpu.memory_space<vmem>>, %arg4: memref<1x128xf32, #tpu.memory_space<vmem>>, %arg5: memref<1x128xf32, #tpu.memory_space<vmem>>, %arg6: memref<1x128xf32, #tpu.memory_space<vmem>>, %arg7: memref<16x128xbf16, #tpu.memory_space<vmem>>, %arg8: memref<16x128xf32, #tpu.memory_space<vmem>>) attributes {dimension_semantics = [#tpu.dimension_semantics<parallel>, #tpu.dimension_semantics<arbitrary>], iteration_bounds = array<i64: 2, 1>, scalar_prefetch = 0 : i64, scratch_operands = 1 : i64, tpu.core_type = #tpu.core_type<tc>, window_params = [{transform_indices = @transform_0, window_bounds = array<i64: 16, 128>}, {transform_indices = @transform_1, window_bounds = array<i64: 128, 128>}, {transform_indices = @transform_2, window_bounds = array<i64: 1, 128>}, {transform_indices = @transform_3, window_bounds = array<i64: 1, 128>}, {pipeline_mode = #tpu.pipeline_mode<synchronous>, transform_indices = @transform_4, window_bounds = array<i64: 1, 128>}, {transform_indices = @transform_5, window_bounds = array<i64: 16, 128>}]} {
    %c0_i32 = arith.constant 0 : i32
    %0 = arith.cmpi eq, %arg1, %c0_i32 : i32
    %1 = arith.extui %0 : i1 to i32
    %c0_i32_0 = arith.constant 0 : i32
    %2 = arith.cmpi ne, %1, %c0_i32_0 : i32
    scf.if %2 {
      %cst_15 = arith.constant 0.000000e+00 : f32
      %22 = vector.broadcast %cst_15 : f32 to vector<16x128xf32>
      %c0_16 = arith.constant 0 : index
      %c0_17 = arith.constant 0 : index
      %23 = vector.load %arg8[%c0_16, %c0_17] : memref<16x128xf32, #tpu.memory_space<vmem>>, vector<16x128xf32>
      tpu.vector_store %arg8[%c0_16, %c0_17], %22 {strides = array<i32>} : memref<16x128xf32, #tpu.memory_space<vmem>>, vector<16x128xf32>,
    } else {
    }
    %c0 = arith.constant 0 : index
    %c0_1 = arith.constant 0 : index
    %3 = vector.load %arg2[%c0, %c0_1] : memref<16x128xbf16, #tpu.memory_space<vmem>>, vector<16x128xbf16>
    %4 = arith.extf %3 : vector<16x128xbf16> to vector<16x128xf32>
    %c0_2 = arith.constant 0 : index
    %c0_3 = arith.constant 0 : index
    %5 = vector.load %arg4[%c0_2, %c0_3] : memref<1x128xf32, #tpu.memory_space<vmem>>, vector<1x128xf32>
    %6 = vector.broadcast %5 : vector<1x128xf32> to vector<16x128xf32>
    %7 = arith.mulf %4, %6 : vector<16x128xf32>
    %c0_4 = arith.constant 0 : index
    %c0_5 = arith.constant 0 : index
    %8 = vector.load %arg5[%c0_4, %c0_5] : memref<1x128xf32, #tpu.memory_space<vmem>>, vector<1x128xf32>
    %9 = vector.broadcast %8 : vector<1x128xf32> to vector<16x128xf32>
    %10 = arith.addf %7, %9 : vector<16x128xf32>
    %cst = arith.constant 0.000000e+00 : f32
    %11 = vector.broadcast %cst : f32 to vector<16x128xf32>
    %12 = arith.maximumf %10, %11 : vector<16x128xf32>
    %13 = arith.truncf %12 : vector<16x128xf32> to vector<16x128xbf16>
    %c0_6 = arith.constant 0 : index
    %c0_7 = arith.constant 0 : index
    %14 = vector.load %arg8[%c0_6, %c0_7] : memref<16x128xf32, #tpu.memory_space<vmem>>, vector<16x128xf32>
    %c0_8 = arith.constant 0 : index
    %c0_9 = arith.constant 0 : index
    %15 = vector.load %arg3[%c0_8, %c0_9] : memref<128x128xbf16, #tpu.memory_space<vmem>>, vector<128x128xbf16>
    %cst_10 = arith.constant dense<0.000000e+00> : vector<16x128xf32>
    %16 = tpu.matmul %13, %15, %cst_10 {dimension_numbers = #tpu.dot_dimension_numbers<[1], [0], [0], [1], [0, 0, 1, 1], [], []>} : vector<16x128xbf16>, vector<128x128xbf16>, vector<16x128xf32> -> vector<16x128xf32>
    %17 = arith.addf %14, %16 : vector<16x128xf32>
    %c0_11 = arith.constant 0 : index
    %c0_12 = arith.constant 0 : index
    %18 = vector.load %arg8[%c0_11, %c0_12] : memref<16x128xf32, #tpu.memory_space<vmem>>, vector<16x128xf32>
    tpu.vector_store %arg8[%c0_11, %c0_12], %17 {strides = array<i32>} : memref<16x128xf32, #tpu.memory_space<vmem>>, vector<16x128xf32>,
    %c0_i32_13 = arith.constant 0 : i32
    %19 = arith.cmpi eq, %arg1, %c0_i32_13 : i32
    %20 = arith.extui %19 : i1 to i32
    %c0_i32_14 = arith.constant 0 : i32
    %21 = arith.cmpi ne, %20, %c0_i32_14 : i32
    scf.if %21 {
      %c0_15 = arith.constant 0 : index
      %c0_16 = arith.constant 0 : index
      %22 = vector.load %arg8[%c0_15, %c0_16] : memref<16x128xf32, #tpu.memory_space<vmem>>, vector<16x128xf32>
      %c0_17 = arith.constant 0 : index
      %c0_18 = arith.constant 0 : index
      %23 = vector.load %arg6[%c0_17, %c0_18] : memref<1x128xf32, #tpu.memory_space<vmem>>, vector<1x128xf32>
      %24 = vector.broadcast %23 : vector<1x128xf32> to vector<16x128xf32>
      %25 = arith.addf %22, %24 : vector<16x128xf32>
      %26 = arith.truncf %25 : vector<16x128xf32> to vector<16x128xbf16>
      %c0_19 = arith.constant 0 : index
      %c0_20 = arith.constant 0 : index
      %27 = vector.load %arg7[%c0_19, %c0_20] : memref<16x128xbf16, #tpu.memory_space<vmem>>, vector<16x128xbf16>
      tpu.vector_store %arg7[%c0_19, %c0_20], %26 {strides = array<i32>} : memref<16x128xbf16, #tpu.memory_space<vmem>>, vector<16x128xbf16>,
    } else {
    }
    return
  }
  func.func @transform_0(%arg0: i32, %arg1: i32) -> (i32, i32) {
    %c0_i32 = arith.constant 0 : i32
    return %arg0, %arg1 : i32, i32
  }
  func.func @transform_1(%arg0: i32, %arg1: i32) -> (i32, i32) {
    %c0_i32 = arith.constant 0 : i32
    %c0_i32_0 = arith.constant 0 : i32
    return %arg1, %c0_i32 : i32, i32
  }
  func.func @transform_2(%arg0: i32, %arg1: i32) -> (i32, i32) {
    %c0_i32 = arith.constant 0 : i32
    %c0_i32_0 = arith.constant 0 : i32
    return %c0_i32, %arg1 : i32, i32
  }
  func.func @transform_3(%arg0: i32, %arg1: i32) -> (i32, i32) {
    %c0_i32 = arith.constant 0 : i32
    %c0_i32_0 = arith.constant 0 : i32
    return %c0_i32, %arg1 : i32, i32
  }
  func.func @transform_4(%arg0: i32, %arg1: i32) -> (i32, i32) {
    %c0_i32 = arith.constant 0 : i32
    %c0_i32_0 = arith.constant 0 : i32
    %c0_i32_1 = arith.constant 0 : i32
    return %c0_i32, %c0_i32_0 : i32, i32
  }
  func.func @transform_5(%arg0: i32, %arg1: i32) -> (i32, i32) {
    %c0_i32 = arith.constant 0 : i32
    %c0_i32_0 = arith.constant 0 : i32
    return %arg0, %c0_i32 : i32, i32
  }
}

module attributes {stable_mosaic.version = 11 : i64} {
  func.func @_pool_kernel(%arg0: i32, %arg1: i32, %arg2: memref<1x16x128xbf16, #tpu.memory_space<vmem>>, %arg3: memref<16x128xbf16, #tpu.memory_space<vmem>>, %arg4: memref<16x128xf32, #tpu.memory_space<vmem>>) attributes {dimension_semantics = [#tpu.dimension_semantics<parallel>, #tpu.dimension_semantics<arbitrary>], iteration_bounds = array<i64: 1, 4>, scalar_prefetch = 0 : i64, scratch_operands = 1 : i64, tpu.core_type = #tpu.core_type<tc>, window_params = [{transform_indices = @transform_0, window_bounds = array<i64: 1, 16, 128>}, {transform_indices = @transform_1, window_bounds = array<i64: 16, 128>}]} {
    %c0_i32 = arith.constant 0 : i32
    %0 = arith.cmpi eq, %arg1, %c0_i32 : i32
    %1 = arith.extui %0 : i1 to i32
    %c0_i32_0 = arith.constant 0 : i32
    %2 = arith.cmpi ne, %1, %c0_i32_0 : i32
    scf.if %2 {
      %cst = arith.constant 0.000000e+00 : f32
      %12 = vector.broadcast %cst : f32 to vector<16x128xf32>
      %c0_8 = arith.constant 0 : index
      %c0_9 = arith.constant 0 : index
      %13 = vector.load %arg4[%c0_8, %c0_9] : memref<16x128xf32, #tpu.memory_space<vmem>>, vector<16x128xf32>
      tpu.vector_store %arg4[%c0_8, %c0_9], %12 {strides = array<i32>} : memref<16x128xf32, #tpu.memory_space<vmem>>, vector<16x128xf32>,
    } else {
    }
    %c0 = arith.constant 0 : index
    %c0_1 = arith.constant 0 : index
    %c0_2 = arith.constant 0 : index
    %3 = vector.load %arg2[%c0, %c0_1, %c0_2] : memref<1x16x128xbf16, #tpu.memory_space<vmem>>, vector<1x16x128xbf16>
    %4 = vector.shape_cast %3 : vector<1x16x128xbf16> to vector<16x128xbf16>
    %5 = arith.extf %4 : vector<16x128xbf16> to vector<16x128xf32>
    %c0_3 = arith.constant 0 : index
    %c0_4 = arith.constant 0 : index
    %6 = vector.load %arg4[%c0_3, %c0_4] : memref<16x128xf32, #tpu.memory_space<vmem>>, vector<16x128xf32>
    %7 = arith.addf %6, %5 : vector<16x128xf32>
    %c0_5 = arith.constant 0 : index
    %c0_6 = arith.constant 0 : index
    %8 = vector.load %arg4[%c0_5, %c0_6] : memref<16x128xf32, #tpu.memory_space<vmem>>, vector<16x128xf32>
    tpu.vector_store %arg4[%c0_5, %c0_6], %7 {strides = array<i32>} : memref<16x128xf32, #tpu.memory_space<vmem>>, vector<16x128xf32>,
    %c3_i32 = arith.constant 3 : i32
    %9 = arith.cmpi eq, %arg1, %c3_i32 : i32
    %10 = arith.extui %9 : i1 to i32
    %c0_i32_7 = arith.constant 0 : i32
    %11 = arith.cmpi ne, %10, %c0_i32_7 : i32
    scf.if %11 {
      %c0_8 = arith.constant 0 : index
      %c0_9 = arith.constant 0 : index
      %12 = vector.load %arg4[%c0_8, %c0_9] : memref<16x128xf32, #tpu.memory_space<vmem>>, vector<16x128xf32>
      %cst = arith.constant 2.500000e-01 : f32
      %13 = vector.broadcast %cst : f32 to vector<16x128xf32>
      %14 = arith.mulf %12, %13 : vector<16x128xf32>
      %15 = arith.truncf %14 : vector<16x128xf32> to vector<16x128xbf16>
      %c0_10 = arith.constant 0 : index
      %c0_11 = arith.constant 0 : index
      %16 = vector.load %arg3[%c0_10, %c0_11] : memref<16x128xbf16, #tpu.memory_space<vmem>>, vector<16x128xbf16>
      tpu.vector_store %arg3[%c0_10, %c0_11], %15 {strides = array<i32>} : memref<16x128xbf16, #tpu.memory_space<vmem>>, vector<16x128xbf16>,
    } else {
    }
    return
  }
  func.func @transform_0(%arg0: i32, %arg1: i32) -> (i32, i32, i32) {
    %c0_i32 = arith.constant 0 : i32
    %c0_i32_0 = arith.constant 0 : i32
    return %arg1, %arg0, %c0_i32 : i32, i32, i32
  }
  func.func @transform_1(%arg0: i32, %arg1: i32) -> (i32, i32) {
    %c0_i32 = arith.constant 0 : i32
    %c0_i32_0 = arith.constant 0 : i32
    return %arg0, %c0_i32 : i32, i32
  }
}

module attributes {stable_mosaic.version = 11 : i64} {
  func.func @_head_kernel(%arg0: i32, %arg1: memref<8x4x128xbf16, #tpu.memory_space<vmem>>, %arg2: memref<1x1x128xf32, #tpu.memory_space<vmem>>, %arg3: memref<1x1x128xf32, #tpu.memory_space<vmem>>, %arg4: memref<128x128xbf16, #tpu.memory_space<vmem>>, %arg5: memref<1x128xf32, #tpu.memory_space<vmem>>, %arg6: memref<8x128xf32, #tpu.memory_space<vmem>>, %arg7: memref<8x128xf32, #tpu.memory_space<vmem>>) attributes {dimension_semantics = [#tpu.dimension_semantics<parallel>], iteration_bounds = array<i64: 1>, scalar_prefetch = 0 : i64, scratch_operands = 0 : i64, tpu.core_type = #tpu.core_type<tc>, window_params = [{transform_indices = @transform_0, window_bounds = array<i64: 8, 4, 128>}, {pipeline_mode = #tpu.pipeline_mode<synchronous>, transform_indices = @transform_1, window_bounds = array<i64: 1, 1, 128>}, {pipeline_mode = #tpu.pipeline_mode<synchronous>, transform_indices = @transform_2, window_bounds = array<i64: 1, 1, 128>}, {pipeline_mode = #tpu.pipeline_mode<synchronous>, transform_indices = @transform_3, window_bounds = array<i64: 128, 128>}, {pipeline_mode = #tpu.pipeline_mode<synchronous>, transform_indices = @transform_4, window_bounds = array<i64: 1, 128>}, {transform_indices = @transform_5, window_bounds = array<i64: 8, 128>}, {transform_indices = @transform_6, window_bounds = array<i64: 8, 128>}]} {
    %c0 = arith.constant 0 : index
    %c0_0 = arith.constant 0 : index
    %c0_1 = arith.constant 0 : index
    %0 = vector.load %arg1[%c0, %c0_0, %c0_1] : memref<8x4x128xbf16, #tpu.memory_space<vmem>>, vector<8x4x128xbf16>
    %1 = arith.extf %0 : vector<8x4x128xbf16> to vector<8x4x128xf32>
    %c0_2 = arith.constant 0 : index
    %c0_3 = arith.constant 0 : index
    %c0_4 = arith.constant 0 : index
    %2 = vector.load %arg2[%c0_2, %c0_3, %c0_4] : memref<1x1x128xf32, #tpu.memory_space<vmem>>, vector<1x1x128xf32>
    %3 = vector.broadcast %2 : vector<1x1x128xf32> to vector<8x4x128xf32>
    %4 = arith.mulf %1, %3 : vector<8x4x128xf32>
    %c0_5 = arith.constant 0 : index
    %c0_6 = arith.constant 0 : index
    %c0_7 = arith.constant 0 : index
    %5 = vector.load %arg3[%c0_5, %c0_6, %c0_7] : memref<1x1x128xf32, #tpu.memory_space<vmem>>, vector<1x1x128xf32>
    %6 = vector.broadcast %5 : vector<1x1x128xf32> to vector<8x4x128xf32>
    %7 = arith.addf %4, %6 : vector<8x4x128xf32>
    %cst = arith.constant 0.000000e+00 : f32
    %8 = vector.broadcast %cst : f32 to vector<8x4x128xf32>
    %9 = arith.maximumf %7, %8 : vector<8x4x128xf32>
    %cst_8 = arith.constant dense<0.000000e+00> : vector<8x128xf32>
    %10 = vector.multi_reduction <add>, %9, %cst_8 [1] : vector<8x4x128xf32> to vector<8x128xf32>
    %cst_9 = arith.constant 2.500000e-01 : f32
    %11 = vector.broadcast %cst_9 : f32 to vector<8x128xf32>
    %12 = arith.mulf %10, %11 : vector<8x128xf32>
    %c0_10 = arith.constant 0 : index
    %c0_11 = arith.constant 0 : index
    %13 = vector.load %arg6[%c0_10, %c0_11] : memref<8x128xf32, #tpu.memory_space<vmem>>, vector<8x128xf32>
    tpu.vector_store %arg6[%c0_10, %c0_11], %12 {strides = array<i32>} : memref<8x128xf32, #tpu.memory_space<vmem>>, vector<8x128xf32>,
    %14 = arith.truncf %12 : vector<8x128xf32> to vector<8x128xbf16>
    %c0_12 = arith.constant 0 : index
    %c0_13 = arith.constant 0 : index
    %15 = vector.load %arg4[%c0_12, %c0_13] : memref<128x128xbf16, #tpu.memory_space<vmem>>, vector<128x128xbf16>
    %cst_14 = arith.constant dense<0.000000e+00> : vector<8x128xf32>
    %16 = tpu.matmul %14, %15, %cst_14 {dimension_numbers = #tpu.dot_dimension_numbers<[1], [0], [0], [1], [0, 0, 1, 1], [], []>} : vector<8x128xbf16>, vector<128x128xbf16>, vector<8x128xf32> -> vector<8x128xf32>
    %c0_15 = arith.constant 0 : index
    %c0_16 = arith.constant 0 : index
    %17 = vector.load %arg5[%c0_15, %c0_16] : memref<1x128xf32, #tpu.memory_space<vmem>>, vector<1x128xf32>
    %18 = vector.broadcast %17 : vector<1x128xf32> to vector<8x128xf32>
    %19 = arith.addf %16, %18 : vector<8x128xf32>
    %c0_17 = arith.constant 0 : index
    %c0_18 = arith.constant 0 : index
    %20 = vector.load %arg7[%c0_17, %c0_18] : memref<8x128xf32, #tpu.memory_space<vmem>>, vector<8x128xf32>
    tpu.vector_store %arg7[%c0_17, %c0_18], %19 {strides = array<i32>} : memref<8x128xf32, #tpu.memory_space<vmem>>, vector<8x128xf32>,
    return
  }
  func.func @transform_0(%arg0: i32) -> (i32, i32, i32) {
    %c0_i32 = arith.constant 0 : i32
    %c0_i32_0 = arith.constant 0 : i32
    %c0_i32_1 = arith.constant 0 : i32
    return %arg0, %c0_i32, %c0_i32_0 : i32, i32, i32
  }
  func.func @transform_1(%arg0: i32) -> (i32, i32, i32) {
    %c0_i32 = arith.constant 0 : i32
    %c0_i32_0 = arith.constant 0 : i32
    %c0_i32_1 = arith.constant 0 : i32
    %c0_i32_2 = arith.constant 0 : i32
    return %c0_i32, %c0_i32_0, %c0_i32_1 : i32, i32, i32
  }
  func.func @transform_2(%arg0: i32) -> (i32, i32, i32) {
    %c0_i32 = arith.constant 0 : i32
    %c0_i32_0 = arith.constant 0 : i32
    %c0_i32_1 = arith.constant 0 : i32
    %c0_i32_2 = arith.constant 0 : i32
    return %c0_i32, %c0_i32_0, %c0_i32_1 : i32, i32, i32
  }
  func.func @transform_3(%arg0: i32) -> (i32, i32) {
    %c0_i32 = arith.constant 0 : i32
    %c0_i32_0 = arith.constant 0 : i32
    %c0_i32_1 = arith.constant 0 : i32
    return %c0_i32, %c0_i32_0 : i32, i32
  }
  func.func @transform_4(%arg0: i32) -> (i32, i32) {
    %c0_i32 = arith.constant 0 : i32
    %c0_i32_0 = arith.constant 0 : i32
    %c0_i32_1 = arith.constant 0 : i32
    return %c0_i32, %c0_i32_0 : i32, i32
  }
  func.func @transform_5(%arg0: i32) -> (i32, i32) {
    %c0_i32 = arith.constant 0 : i32
    %c0_i32_0 = arith.constant 0 : i32
    return %arg0, %c0_i32 : i32, i32
  }
  func.func @transform_6(%arg0: i32) -> (i32, i32) {
    %c0_i32 = arith.constant 0 : i32
    %c0_i32_0 = arith.constant 0 : i32
    return %arg0, %c0_i32 : i32, i32
  }
}

</mosaic_0001>

<bundles_post_ra>
// kernel: pretrained_resnet50_forward.9
= control target key start
LH: loop header
LB: loop body
LE: loop exit
PB: predicated region body
PF: predicated region fallthrough
CT: control target
= control target key end

     0   :  { %s1000_s18 = smov 0   ;;  %s1002_s19 = smov 0   ;;  %s1115_s0 = inlined_call_operand.vmem [shape: bf16[128,256], index: 0, kind: input, shape index: {}]   ;;  %s1116_s1 = inlined_call_operand.vmem [shape: bf16[256,128], index: 1, kind: input, shape index: {}]   ;;  %s1117_s2 = inlined_call_operand.vmem [shape: f32[1,256], index: 2, kind: input, shape index: {}, may-alias: {2,3}]   ;;  %s1118_s3 = inlined_call_operand.vmem [shape: f32[1,256], index: 3, kind: input, shape index: {}, may-alias: {2,3}]   ;;  %s1119_s4 = inlined_call_operand.vmem [shape: f32[1,128], index: 4, kind: input, shape index: {}]   ;;  %s1120_s5 = inlined_call_operand.vmem [shape: bf16[128,128], index: 5, kind: output, shape index: {}]  }
   0x1   :  { %s1004_s20 = smov 0  }
   0x2 LB: > { %s27_s2 = sadd.s32 1, %s964_s19  ;;  %p753_p0 = scmp.ge.s32.totalorder %s968_s20, 1  ;;  %s968_s20 = sphi %s1004_s20, %s15_s20   ;;  %s964_s19 = sphi %s1002_s19, %s1122_s19   ;;  %s960_s18 = sphi %s1000_s18, %s1121_s18  }
   0x3   : > { %p29_p1 = scmp.ge.s32.totalorder %s27_s2, 2  ;;  %p239_p2 = scmp.lt.s32.totalorder %s968_s20, 3 }
   0x5   : > { %s1124_s2 = smov (%p29_p1, %s27_s2), 0  ;;  %p240_p3 = pnand %p753_p0, %p239_p2 }
   0x6   : > { %s754_s7 = sshll.u32 (!%p240_p3), %s960_s18, 3 }
   0x7   : > { %243 = sbr.rel (%p240_p3) target bundleno = 210 (0xd2), region = 40  ;;  %p287_p4 = scmp.lt.s32.totalorder (!%p240_p3), %s754_s7, 15 }
   0xc   : > { %v873_v0 = vld [vmem:[%s1116_s1 + $0x38] sm:$0xff]  ;;  %v872_v2 = vld [vmem:[%s1116_s1 + $0x30] sm:$0xff]  ;;  %v871_v4 = vld [vmem:[%s1116_s1 + $0x28] sm:$0xff]  ;;  %s1126_s7 = smov (!%p287_p4, %s754_s7), 15 }
   0xd   : > { %v881_v1 = vld [vmem:[%s1116_s1 + $0x78] sm:$0xff]  ;;  %515 = vmatpush.bf16.msra.mxu0 %v873_v0  ;;  %905 = vmatpush.bf16.msra.mxu2 %v873_v0  ;;  %v880_v3 = vld [vmem:[%s1116_s1 + $0x70] sm:$0xff]  ;;  %v879_v5 = vld [vmem:[%s1116_s1 + $0x68] sm:$0xff]  ;;  %s857_s21 = sshll.u32 %s1126_s7, 3  ;;  %s758_s11 = sshll.u32 %s1126_s7, 2 }
   0xe   : > { %544 = vmatpush.bf16.msra.mxu1 %v881_v1  ;;  %913 = vmatpush.bf16.msra.mxu3 %v881_v1  ;;  %v870_v6 = vld [vmem:[%s1116_s1 + $0x20] sm:$0xff]  ;;  %v869_v8 = vld [vmem:[%s1116_s1 + $0x18] sm:$0xff]  ;;  %v868_v10 = vld [vmem:[%s1116_s1 + $0x10] sm:$0xff]  ;;  %s1066_s26 = scalar_lea.vmem %s1115_s0, %s857_s21  ;;  %s1100_s14 = scalar_lea.vmem %s1120_s5, %s758_s11 }
   0xf   : > { %v878_v7 = vld [vmem:[%s1116_s1 + $0x60] sm:$0xff]  ;;  %v877_v9 = vld [vmem:[%s1116_s1 + $0x58] sm:$0xff]  ;;  %v876_v11 = vld [vmem:[%s1116_s1 + $0x50] sm:$0xff] }
  0x10   : > { %v867_v12 = vld [vmem:[%s1116_s1 + $0x8] sm:$0xff]  ;;  %v866_v14 = vld [vmem:[%s1116_s1] sm:$0xff]  ;;  %v769_v28 = vld [vmem:[%s1066_s26 + $0x10] sm:$0xf] }
  0x11   : > { %516 = vmatpush.bf16.msra.mxu0 %v872_v2  ;;  %906 = vmatpush.bf16.msra.mxu2 %v872_v2  ;;  %v875_v13 = vld [vmem:[%s1116_s1 + $0x48] sm:$0xff]  ;;  %v874_v15 = vld [vmem:[%s1116_s1 + $0x40] sm:$0xff]  ;;  %v861_v29 = vld [vmem:[%s1066_s26 + $0x14] sm:$0xf0] }
  0x12   : > { %545 = vmatpush.bf16.msra.mxu1 %v880_v3  ;;  %914 = vmatpush.bf16.msra.mxu3 %v880_v3  ;;  %v761_v16 = vld [vmem:[%s1066_s26] sm:$0xf]  ;;  %v859_v17 = vld [vmem:[%s1066_s26 + $0x4] sm:$0xf0]  ;;  %v858_v20 = vld [vmem:[%s1066_s26 + $0x4] sm:$0xf]  ;;  %v770_v36 = vor.u32 %v861_v29, %v769_v28 }
  0x13   : > { %v777_v18 = vld [vmem:[%s1066_s26 + $0x20] sm:$0xf]  ;;  %v863_v19 = vld [vmem:[%s1066_s26 + $0x24] sm:$0xf0]  ;;  %v763_v21 = vld [vmem:[%s1066_s26 + $0x8] sm:$0xf0]  ;;  %v762_v24 = vor.u32 %v859_v17, %v761_v16 }
  0x14   : > { %v862_v22 = vld [vmem:[%s1066_s26 + $0x24] sm:$0xf]  ;;  %v779_v23 = vld [vmem:[%s1066_s26 + $0x28] sm:$0xf0]  ;;  %v778_v25 = vor.u32 %v863_v19, %v777_v18  ;;  %v766_v26 = vor.u32 %v858_v20, %v763_v21  ;;  %v785_v30 = vld [vmem:[%s1066_s26 + $0x30] sm:$0xf] }
  0x15   : > { %517 = vmatpush.bf16.msra.mxu0 %v871_v4  ;;  %907 = vmatpush.bf16.msra.mxu2 %v871_v4  ;;  %v782_v27 = vor.u32 %v862_v22, %v779_v23  ;;  %v865_v31 = vld [vmem:[%s1066_s26 + $0x34] sm:$0xf0]  ;;  %v860_v32 = vld [vmem:[%s1066_s26 + $0x14] sm:$0xf]  ;;  %v771_v33 = vld [vmem:[%s1066_s26 + $0x18] sm:$0xf0] }
  0x16   : > { %546 = vmatpush.bf16.msra.mxu1 %v879_v5  ;;  %915 = vmatpush.bf16.msra.mxu3 %v879_v5  ;;  %v864_v34 = vld [vmem:[%s1066_s26 + $0x34] sm:$0xf]  ;;  %v787_v35 = vld [vmem:[%s1066_s26 + $0x38] sm:$0xf0]  ;;  %v786_v37 = vor.u32 %v865_v31, %v785_v30  ;;  %v774_v38 = vor.u32 %v860_v32, %v771_v33  ;;  %v945_v43 = vld [vmem:[%s1119_s4] ss:$0 sm:$0xff] }
  0x17   : > { %v790_v39 = vor.u32 %v864_v34, %v787_v35 }
  0x19   : > { %518 = vmatpush.bf16.msra.mxu0 %v870_v6  ;;  %908 = vmatpush.bf16.msra.mxu2 %v870_v6 }
  0x1a   : > { %547 = vmatpush.bf16.msra.mxu1 %v878_v7  ;;  %916 = vmatpush.bf16.msra.mxu3 %v878_v7 }
  0x1d   : > { %519 = vmatpush.bf16.msra.mxu0 %v869_v8  ;;  %909 = vmatpush.bf16.msra.mxu2 %v869_v8 }
  0x1e   : > { %548 = vmatpush.bf16.msra.mxu1 %v877_v9  ;;  %917 = vmatpush.bf16.msra.mxu3 %v877_v9 }
  0x21   : > { %520 = vmatpush.bf16.msra.mxu0 %v868_v10  ;;  %910 = vmatpush.bf16.msra.mxu2 %v868_v10 }
  0x22   : > { %549 = vmatpush.bf16.msra.mxu1 %v876_v11  ;;  %918 = vmatpush.bf16.msra.mxu3 %v876_v11 }
  0x25   : > { %521 = vmatpush.bf16.msra.mxu0 %v867_v12  ;;  %911 = vmatpush.bf16.msra.mxu2 %v867_v12 }
  0x26   : > { %550 = vmatpush.bf16.msra.mxu1 %v875_v13  ;;  %919 = vmatpush.bf16.msra.mxu3 %v875_v13 }
  0x29   : > { %522 = vmatpush.bf16.msra.mxu0 %v866_v14  ;;  %912 = vmatpush.bf16.msra.mxu2 %v866_v14 }
  0x2a   : > { %551 = vmatpush.bf16.msra.mxu1 %v874_v15  ;;  %920 = vmatpush.bf16.msra.mxu3 %v874_v15 }
  0x2c   : > { %523 = vmatmul.bf16.vlgmr.msra.gmra.mxu0 %v762_v24  ;;  %533 = vmatmul.bf16.vlgmr.msra.gmra.mxu2 %v778_v25 }
  0x2d   : > { %552 = vmatmul.bf16.vlgmr.msra.gmra.mxu1 %v766_v26  ;;  %562 = vmatmul.bf16.vlgmr.msra.gmra.mxu3 %v782_v27 }
  0x3c   : > { %528 = vmatmul.bf16.gmra.mxu0 %v770_v36  ;;  %538 = vmatmul.bf16.gmra.mxu2 %v786_v37 }
  0x3d   : > { %557 = vmatmul.bf16.gmra.mxu1 %v774_v38  ;;  %567 = vmatmul.bf16.gmra.mxu3 %v790_v39 }
  0xa9   : > { %v524_v40 = vpop.f32.mrf.mxu0 }
  0xaa   : > { %v553_v41 = vpop.f32.mrf.mxu1 }
  0xab   : > { %v554_v42 = vadd.f32 %v553_v41, %v524_v40 }
  0xad   : > { %v604_v48 = vadd.f32 %v945_v43, %v554_v42 }
  0xaf   : > { %v534_v44 = vpop.f32.mrf.mxu2  ;;  %v612_v52 = vmax.f32 %v604_v48, 0.0 }
  0xb0   : > { %v563_v45 = vpop.f32.mrf.mxu3 }
  0xb1   : > { %v526_v46 = vpop.f32.mrf.mxu0  ;;  %v564_v50 = vadd.f32 %v563_v45, %v534_v44 }
  0xb2   : > { %v555_v47 = vpop.f32.mrf.mxu1 }
  0xb3   : > { %v556_v49 = vadd.f32 %v555_v47, %v526_v46  ;;  %v608_v56 = vadd.f32 %v945_v43, %v564_v50 }
  0xb5   : > { %v605_v51 = vadd.f32 %v945_v43, %v556_v49  ;;  %v616_v62 = vmax.f32 %v608_v56, 0.0 }
  0xb7   : > { %v613_v53 = vmax.f32 %v605_v51, 0.0  ;;  %v536_v54 = vpop.f32.mrf.mxu2 }
  0xb8   : > { %v565_v55 = vpop.f32.mrf.mxu3 }
  0xb9   : > { %v885_v57 = vpack.c.bf16 %v613_v53, %v612_v52  ;;  %v566_v58 = vadd.f32 %v565_v55, %v536_v54  ;;  %v529_v59 = vpop.f32.mrf.mxu0 }
  0xba   : > { %v558_v60 = vpop.f32.mrf.mxu1 }
  0xbb   : > { %886 = vst [vmem:[%s1100_s14] sm:$0xff] %v885_v57   ;;  %v609_v61 = vadd.f32 %v945_v43, %v566_v58  ;;  %v559_v1 = vadd.f32 %v558_v60, %v529_v59 }
  0xbd   : > { %v617_v63 = vmax.f32 %v609_v61, 0.0  ;;  %v606_v6 = vadd.f32 %v945_v43, %v559_v1 }
  0xbf   : > { %v895_v0 = vpack.c.bf16 %v617_v63, %v616_v62  ;;  %v539_v2 = vpop.f32.mrf.mxu2  ;;  %v614_v10 = vmax.f32 %v606_v6, 0.0 }
  0xc0   : > { %v568_v3 = vpop.f32.mrf.mxu3 }
  0xc1   : > { %903 = vst [vmem:[%s1100_s14 + $0x10] sm:$0xff] %v895_v0   ;;  %v531_v4 = vpop.f32.mrf.mxu0  ;;  %v569_v8 = vadd.f32 %v568_v3, %v539_v2 }
  0xc2   : > { %v560_v5 = vpop.f32.mrf.mxu1 }
  0xc3   : > { %v561_v7 = vadd.f32 %v560_v5, %v531_v4  ;;  %v610_v14 = vadd.f32 %v945_v43, %v569_v8 }
  0xc5   : > { %v607_v9 = vadd.f32 %v945_v43, %v561_v7  ;;  %v618_v18 = vmax.f32 %v610_v14, 0.0 }
  0xc7   : > { %v615_v11 = vmax.f32 %v607_v9, 0.0  ;;  %v541_v12 = vpop.f32.mrf.mxu2 }
  0xc8   : > { %v570_v13 = vpop.f32.mrf.mxu3 }
  0xc9   : > { %v890_v15 = vpack.c.bf16 %v615_v11, %v614_v10  ;;  %v571_v16 = vadd.f32 %v570_v13, %v541_v12 }
  0xcb   : > { %902 = vst [vmem:[%s1100_s14 + $0x8] sm:$0xff] %v890_v15   ;;  %v611_v17 = vadd.f32 %v945_v43, %v571_v16 }
  0xcd   : > { %v619_v19 = vmax.f32 %v611_v17, 0.0 }
  0xcf   : > { %v900_v20 = vpack.c.bf16 %v619_v19, %v618_v18 }
  0xd1   : > { %904 = vst [vmem:[%s1100_s14 + $0x18] sm:$0xff] %v900_v20  }
  0xd2 PF: > { %s15_s20 = sadd.s32 1, %s968_s20   ;;  %s1121_s18 = smov %s964_s19 }
  0xd3   : > { %p12_p5 = scmp.ge.s32.totalorder %s15_s20, 4   ;;  %s1122_s19 = smov %s1124_s2 }
  0xd5   :  { %14 = sbr.rel (!%p12_p5) target bundleno = 2 (0x2), region = 87 }

// kernel: pretrained_resnet50_forward.10
= control target key start
LH: loop header
LB: loop body
LE: loop exit
PB: predicated region body
PF: predicated region fallthrough
CT: control target
= control target key end

     0   :  { %s361_s6 = smov 0   ;;  %s363_s7 = smov 0   ;;  %s418_s0 = inlined_call_operand.vmem [shape: bf16[9,32,128], index: 0, kind: input, shape index: {}]   ;;  %s419_s1 = inlined_call_operand.vmem [shape: bf16[32,128], index: 1, kind: output, shape index: {}]  }
   0x1   :  { %s365_s8 = smov 0   ;;  %s367_s9 = smov 0  }
   0x2   :  { %s369_s10 = smov 0  }
   0x3 LB: > { %s20_s11 = sadd.s32 1, %s340_s8  ;;  %s23_s12 = sadd.s32 1, %s344_s9  ;;  %s348_s10 = sphi %s369_s10, %s11_s10   ;;  %s344_s9 = sphi %s367_s9, %s423_s9   ;;  %s340_s8 = sphi %s365_s8, %s422_s8   ;;  %s336_s7 = sphi %s363_s7, %s421_s7   ;;  %s332_s6 = sphi %s361_s6, %s420_s6  }
   0x4   : > { %p21_p0 = scmp.ge.s32.totalorder %s20_s11, 9  ;;  %p250_p1 = scmp.ge.s32.totalorder %s348_s10, 1 }
   0x5   : > { %p106_p2 = scmp.lt.s32.totalorder %s348_s10, 19 }
   0x6   : > { %s425_s11 = smov (%p21_p0, %s20_s11), 0  ;;  %s427_s12 = smov (!%p21_p0, %s23_s12), %s344_s9 }
   0x7   : > { %p107_p3 = pnand %p250_p1, %p106_p2  ;;  %p25_p4 = scmp.ge.s32.totalorder %s427_s12, 2 }
   0x8   : > { %s251_s13 = sshll.u32 (!%p107_p3), %s336_s7, 1  ;;  %p131_p5 = scmp.lt.s32.totalorder (!%p107_p3), %s332_s6, 8 }
   0x9   : > { %s429_s12 = smov (%p25_p4, %s427_s12), 0  ;;  %110 = sbr.rel (%p107_p3) target bundleno = 43 (0x2b), region = 24 }
   0xa   : > { %p133_p6 = scmp.lt.s32.totalorder (!%p107_p3), %s251_s13, 3  ;;  %p256_p7 = scmp.ne.s32.totalorder (!%p107_p3), %s332_s6, 0 }
   0xe   : > { %s132_s14 = scalar_select %p131_p5, %s332_s6, 8 }
   0xf   : > { %s431_s13 = smov (!%p133_p6, %s251_s13), 3  ;;  %149 = sbr.rel (%p256_p7) target bundleno = 23 (0x17), region = 28 }
  0x10   : > { %s252_s15 = sshll.u32 %s132_s14, 2  ;;  %s255_s17 = sshll.u32 %s431_s13, 2 }
  0x11   : > { %s136_s16 = sadd.s32 %s252_s15, %s431_s13  ;;  %s144_s21 = scalar_lea.vmem %s419_s1, %s255_s17 }
  0x12   : > { %s253_s18 = sshll.u32 %s136_s16, 2 }
  0x13   : > { %s138_s24 = scalar_lea.vmem %s418_s0, %s253_s18 }
  0x14   : > { %v350_v0 = vmov -1e+30  }
  0x15   : > { %150 = vst [vmem:[#allocation2] sm:$0xff] %v350_v0 }
  0x16   : > { %151 = vst [vmem:[#allocation2 + $0x8] sm:$0xff] %v350_v0 }
  0x17 PF: > { %v261_v1 = vld [vmem:[%s138_s24] sm:$0xff]   ;;  %p257_p8 = scmp.ne.s32.totalorder %s332_s6, 8 }
  0x18   : > { %v262_v4 = vunpack.c.l.bf16 %v261_v1  ;;  %v263_v5 = vunpack.c.h.bf16 %v261_v1 }
  0x1c   : > { %v156_v2 = vld [vmem:[#allocation2] sm:$0xff]  ;;  %165 = sbr.rel (%p257_p8) target bundleno = 43 (0x2b), region = 32 }
  0x1d   : > { %v157_v3 = vld [vmem:[#allocation2 + $0x8] sm:$0xff]  ;;  %v158_v6 = vmax.f32 %v156_v2, %v262_v4 }
  0x1e   : > { %v159_v7 = vmax.f32 %v157_v3, %v263_v5 }
  0x1f   : > { %160 = vst [vmem:[#allocation2] sm:$0xff] %v158_v6 }
  0x20   : > { %161 = vst [vmem:[#allocation2 + $0x8] sm:$0xff] %v159_v7 }
  0x26   : > { %v166_v8 = vld [vmem:[#allocation2] sm:$0xff] }
  0x27   : > { %v167_v9 = vld [vmem:[#allocation2 + $0x8] sm:$0xff] }
  0x28   : > { %v267_v10 = vpack.c.bf16 %v167_v9, %v166_v8 }
  0x2a   : > { %268 = vst [vmem:[%s144_s21] sm:$0xff] %v267_v10  }
  0x2b PF: > { %s11_s10 = sadd.s32 1, %s348_s10   ;;  %s420_s6 = smov %s340_s8 }
  0x2c   : > { %p8_p9 = scmp.ge.s32.totalorder %s11_s10, 20   ;;  %s421_s7 = smov %s344_s9 }
  0x2d   : > { %s422_s8 = smov %s425_s11  ;;  %s423_s9 = smov %s429_s12 }
  0x2e   :  { %10 = sbr.rel (!%p8_p9) target bundleno = 3 (0x3), region = 62 }

// kernel: pretrained_resnet50_forward.11
= control target key start
LH: loop header
LB: loop body
LE: loop exit
PB: predicated region body
PF: predicated region fallthrough
CT: control target
= control target key end

     0   :  { %s678_s18 = smov 0   ;;  %s680_s19 = smov 0   ;;  %s751_s0 = inlined_call_operand.vmem [shape: bf16[32,128], index: 0, kind: input, shape index: {}]   ;;  %s752_s1 = inlined_call_operand.vmem [shape: bf16[128,128], index: 1, kind: input, shape index: {}]   ;;  %s753_s2 = inlined_call_operand.vmem [shape: f32[1,128], index: 2, kind: input, shape index: {}]   ;;  %s754_s3 = inlined_call_operand.vmem [shape: f32[1,128], index: 3, kind: input, shape index: {}]   ;;  %s755_s4 = inlined_call_operand.vmem [shape: f32[1,128], index: 4, kind: input, shape index: {}]   ;;  %s756_s5 = inlined_call_operand.vmem [shape: bf16[32,128], index: 5, kind: output, shape index: {}]  }
   0x1   :  { %s682_s20 = smov 0  }
   0x2 LB: > { %s27_s21 = sadd.s32 1, %s642_s19  ;;  %p541_p0 = scmp.ge.s32.totalorder %s646_s20, 1  ;;  %s646_s20 = sphi %s682_s20, %s15_s20   ;;  %s642_s19 = sphi %s680_s19, %s758_s19   ;;  %s638_s18 = sphi %s678_s18, %s757_s18  }
   0x3   : > { %p29_p1 = scmp.ge.s32.totalorder %s27_s21, 2  ;;  %p232_p2 = scmp.lt.s32.totalorder %s646_s20, 3 }
   0x5   : > { %s760_s21 = smov (%p29_p1, %s27_s21), 0  ;;  %p233_p3 = pnand %p541_p0, %p232_p2 }
   0x6   : > { %s542_s24 = sshll.u32 (!%p233_p3), %s638_s18, 1 }
   0x7   : > { %236 = sbr.rel (%p233_p3) target bundleno = 185 (0xb9), region = 40  ;;  %p275_p4 = scmp.lt.s32.totalorder (!%p233_p3), %s542_s24, 3 }
   0xc   : > { %v587_v0 = vld [vmem:[%s752_s1 + $0x38] sm:$0xff]  ;;  %v586_v1 = vld [vmem:[%s752_s1 + $0x30] sm:$0xff]  ;;  %s762_s24 = smov (!%p275_p4, %s542_s24), 3  ;;  %v585_v2 = vld [vmem:[%s752_s1 + $0x28] sm:$0xff] }
   0xd   : > { %392 = vmatpush.bf16.msra.mxu0 %v587_v0  ;;  %s543_s27 = sshll.u32 %s762_s24, 2  ;;  %v584_v3 = vld [vmem:[%s752_s1 + $0x20] sm:$0xff]  ;;  %v583_v8 = vld [vmem:[%s752_s1 + $0x18] sm:$0xff]  ;;  %v582_v12 = vld [vmem:[%s752_s1 + $0x10] sm:$0xff] }
   0xe   : > { %s281_s7 = scalar_lea.vmem %s751_s0, %s543_s27  ;;  %v621_v7 = vld [vmem:[%s753_s2] ss:$0 sm:$0xff]  ;;  %v581_v15 = vld [vmem:[%s752_s1 + $0x8] sm:$0xff]  ;;  %s299_s6 = scalar_lea.vmem %s756_s5, %s543_s27 }
   0xf   : > { %v589_v4 = vld [vmem:[%s281_s7] sm:$0xff]  }
  0x10   : > { %v590_v5 = vunpack.c.l.bf16 %v589_v4  ;;  %v591_v6 = vunpack.c.h.bf16 %v589_v4  ;;  %v622_v11 = vld [vmem:[%s754_s3] ss:$0 sm:$0xff] }
  0x11   : > { %393 = vmatpush.bf16.msra.mxu0 %v586_v1  ;;  %v580_v18 = vld [vmem:[%s752_s1] sm:$0xff] }
  0x12   : > { %v315_v9 = vmul.f32 %v621_v7, %v590_v5  ;;  %v316_v10 = vmul.f32 %v621_v7, %v591_v6  ;;  %v623_v21 = vld [vmem:[%s755_s4] ss:$0 sm:$0xff] }
  0x14   : > { %v321_v13 = vadd.f32 %v622_v11, %v315_v9  ;;  %v322_v14 = vadd.f32 %v622_v11, %v316_v10 }
  0x15   : > { %394 = vmatpush.bf16.msra.mxu0 %v585_v2 }
  0x16   : > { %v323_v16 = vmax.f32 %v321_v13, 0.0  ;;  %v324_v17 = vmax.f32 %v322_v14, 0.0 }
  0x18   : > { %v325_v19 = vpack.c.bf16 %v324_v17, %v323_v16 }
  0x19   : > { %395 = vmatpush.bf16.msra.mxu0 %v584_v3 }
  0x1d   : > { %396 = vmatpush.bf16.msra.mxu0 %v583_v8 }
  0x21   : > { %397 = vmatpush.bf16.msra.mxu0 %v582_v12 }
  0x25   : > { %398 = vmatpush.bf16.msra.mxu0 %v581_v15 }
  0x29   : > { %399 = vmatpush.bf16.msra.mxu0 %v580_v18 }
  0x2c   : > { %400 = vmatmul.bf16.vlgmr.msra.gmra.mxu0 %v325_v19 }
  0xa9   : > { %v401_v20 = vpop.f32.mrf.mxu0 }
  0xaa   : > { %v419_v22 = vadd.f32 %v623_v21, %v401_v20 }
  0xac   : > { %v421_v25 = vmax.f32 %v419_v22, 0.0 }
  0xb1   : > { %v403_v23 = vpop.f32.mrf.mxu0 }
  0xb2   : > { %v420_v24 = vadd.f32 %v623_v21, %v403_v23 }
  0xb4   : > { %v422_v26 = vmax.f32 %v420_v24, 0.0 }
  0xb6   : > { %v595_v27 = vpack.c.bf16 %v422_v26, %v421_v25 }
  0xb8   : > { %596 = vst [vmem:[%s299_s6] sm:$0xff] %v595_v27  }
  0xb9 PF: > { %s15_s20 = sadd.s32 1, %s646_s20   ;;  %s757_s18 = smov %s642_s19 }
  0xba   : > { %p12_p5 = scmp.ge.s32.totalorder %s15_s20, 4   ;;  %s758_s19 = smov %s760_s21 }
  0xbc   :  { %14 = sbr.rel (!%p12_p5) target bundleno = 2 (0x2), region = 87 }

// kernel: pretrained_resnet50_forward.12
= control target key start
LH: loop header
LB: loop body
LE: loop exit
PB: predicated region body
PF: predicated region fallthrough
CT: control target
= control target key end

     0   :  { %s814_s18 = smov 0   ;;  %s816_s19 = smov 0   ;;  %s905_s0 = inlined_call_operand.vmem [shape: bf16[32,256], index: 0, kind: input, shape index: {}]   ;;  %s906_s1 = inlined_call_operand.vmem [shape: bf16[256,128], index: 1, kind: input, shape index: {}]   ;;  %s907_s2 = inlined_call_operand.vmem [shape: f32[1,256], index: 2, kind: input, shape index: {}, may-alias: {2,3}]   ;;  %s908_s3 = inlined_call_operand.vmem [shape: f32[1,256], index: 3, kind: input, shape index: {}, may-alias: {2,3}]   ;;  %s909_s4 = inlined_call_operand.vmem [shape: f32[1,128], index: 4, kind: input, shape index: {}]   ;;  %s910_s5 = inlined_call_operand.vmem [shape: bf16[32,128], index: 5, kind: output, shape index: {}]  }
   0x1   :  { %s818_s20 = smov 0  }
   0x2 LB: > { %s27_s2 = sadd.s32 1, %s778_s19  ;;  %p631_p0 = scmp.ge.s32.totalorder %s782_s20, 1  ;;  %s782_s20 = sphi %s818_s20, %s15_s20   ;;  %s778_s19 = sphi %s816_s19, %s912_s19   ;;  %s774_s18 = sphi %s814_s18, %s911_s18  }
   0x3   : > { %p29_p1 = scmp.ge.s32.totalorder %s27_s2, 2  ;;  %p239_p2 = scmp.lt.s32.totalorder %s782_s20, 3 }
   0x5   : > { %s914_s2 = smov (%p29_p1, %s27_s2), 0  ;;  %p240_p3 = pnand %p631_p0, %p239_p2 }
   0x6   : > { %s632_s7 = sshll.u32 (!%p240_p3), %s774_s18, 1 }
   0x7   : > { %243 = sbr.rel (%p240_p3) target bundleno = 186 (0xba), region = 40  ;;  %p287_p4 = scmp.lt.s32.totalorder (!%p240_p3), %s632_s7, 3 }
   0xc   : > { %v721_v0 = vld [vmem:[%s906_s1 + $0x38] sm:$0xff]  ;;  %v720_v2 = vld [vmem:[%s906_s1 + $0x30] sm:$0xff]  ;;  %v719_v4 = vld [vmem:[%s906_s1 + $0x28] sm:$0xff]  ;;  %s916_s7 = smov (!%p287_p4, %s632_s7), 3 }
   0xd   : > { %v729_v1 = vld [vmem:[%s906_s1 + $0x78] sm:$0xff]  ;;  %467 = vmatpush.bf16.msra.mxu0 %v721_v0  ;;  %v728_v3 = vld [vmem:[%s906_s1 + $0x70] sm:$0xff]  ;;  %v727_v5 = vld [vmem:[%s906_s1 + $0x68] sm:$0xff]  ;;  %s711_s21 = sshll.u32 %s916_s7, 3  ;;  %s636_s11 = sshll.u32 %s916_s7, 2 }
   0xe   : > { %481 = vmatpush.bf16.msra.mxu1 %v729_v1  ;;  %v718_v6 = vld [vmem:[%s906_s1 + $0x20] sm:$0xff]  ;;  %v717_v8 = vld [vmem:[%s906_s1 + $0x18] sm:$0xff]  ;;  %v716_v10 = vld [vmem:[%s906_s1 + $0x10] sm:$0xff]  ;;  %s294_s28 = scalar_lea.vmem %s905_s0, %s711_s21  ;;  %s317_s14 = scalar_lea.vmem %s910_s5, %s636_s11 }
   0xf   : > { %v726_v7 = vld [vmem:[%s906_s1 + $0x60] sm:$0xff]  ;;  %v725_v9 = vld [vmem:[%s906_s1 + $0x58] sm:$0xff]  ;;  %v724_v11 = vld [vmem:[%s906_s1 + $0x50] sm:$0xff] }
  0x10   : > { %v715_v12 = vld [vmem:[%s906_s1 + $0x8] sm:$0xff]  ;;  %v714_v14 = vld [vmem:[%s906_s1] sm:$0xff] }
  0x11   : > { %468 = vmatpush.bf16.msra.mxu0 %v720_v2  ;;  %v723_v13 = vld [vmem:[%s906_s1 + $0x48] sm:$0xff]  ;;  %v722_v15 = vld [vmem:[%s906_s1 + $0x40] sm:$0xff] }
  0x12   : > { %482 = vmatpush.bf16.msra.mxu1 %v728_v3  ;;  %v639_v16 = vld [vmem:[%s294_s28] sm:$0xf]  ;;  %v713_v17 = vld [vmem:[%s294_s28 + $0x4] sm:$0xf0]  ;;  %v712_v18 = vld [vmem:[%s294_s28 + $0x4] sm:$0xf] }
  0x13   : > { %v641_v19 = vld [vmem:[%s294_s28 + $0x8] sm:$0xf0]  ;;  %v640_v20 = vor.u32 %v713_v17, %v639_v16  ;;  %v759_v25 = vld [vmem:[%s909_s4] ss:$0 sm:$0xff] }
  0x14   : > { %v644_v21 = vor.u32 %v712_v18, %v641_v19 }
  0x15   : > { %469 = vmatpush.bf16.msra.mxu0 %v719_v4 }
  0x16   : > { %483 = vmatpush.bf16.msra.mxu1 %v727_v5 }
  0x19   : > { %470 = vmatpush.bf16.msra.mxu0 %v718_v6 }
  0x1a   : > { %484 = vmatpush.bf16.msra.mxu1 %v726_v7 }
  0x1d   : > { %471 = vmatpush.bf16.msra.mxu0 %v717_v8 }
  0x1e   : > { %485 = vmatpush.bf16.msra.mxu1 %v725_v9 }
  0x21   : > { %472 = vmatpush.bf16.msra.mxu0 %v716_v10 }
  0x22   : > { %486 = vmatpush.bf16.msra.mxu1 %v724_v11 }
  0x25   : > { %473 = vmatpush.bf16.msra.mxu0 %v715_v12 }
  0x26   : > { %487 = vmatpush.bf16.msra.mxu1 %v723_v13 }
  0x29   : > { %474 = vmatpush.bf16.msra.mxu0 %v714_v14 }
  0x2a   : > { %488 = vmatpush.bf16.msra.mxu1 %v722_v15 }
  0x2c   : > { %475 = vmatmul.bf16.vlgmr.msra.gmra.mxu0 %v640_v20 }
  0x2d   : > { %489 = vmatmul.bf16.vlgmr.msra.gmra.mxu1 %v644_v21 }
  0xa9   : > { %v476_v22 = vpop.f32.mrf.mxu0 }
  0xaa   : > { %v490_v23 = vpop.f32.mrf.mxu1 }
  0xab   : > { %v491_v24 = vadd.f32 %v490_v23, %v476_v22 }
  0xad   : > { %v508_v29 = vadd.f32 %v759_v25, %v491_v24 }
  0xb1   : > { %v478_v26 = vpop.f32.mrf.mxu0 }
  0xb2   : > { %v492_v27 = vpop.f32.mrf.mxu1 }
  0xb3   : > { %v493_v28 = vadd.f32 %v492_v27, %v478_v26 }
  0xb5   : > { %v509_v30 = vadd.f32 %v759_v25, %v493_v28 }
  0xb7   : > { %v733_v31 = vpack.c.bf16 %v509_v30, %v508_v29 }
  0xb9   : > { %734 = vst [vmem:[%s317_s14] sm:$0xff] %v733_v31  }
  0xba PF: > { %s15_s20 = sadd.s32 1, %s782_s20   ;;  %s911_s18 = smov %s778_s19 }
  0xbb   : > { %p12_p5 = scmp.ge.s32.totalorder %s15_s20, 4   ;;  %s912_s19 = smov %s914_s2 }
  0xbd   :  { %14 = sbr.rel (!%p12_p5) target bundleno = 2 (0x2), region = 87 }

// kernel: pretrained_resnet50_forward.15
= control target key start
LH: loop header
LB: loop body
LE: loop exit
PB: predicated region body
PF: predicated region fallthrough
CT: control target
= control target key end

     0   :  { %s676_s18 = smov 0   ;;  %s678_s19 = smov 0   ;;  %s749_s0 = inlined_call_operand.vmem [shape: bf16[32,128], index: 0, kind: input, shape index: {}]   ;;  %s750_s1 = inlined_call_operand.vmem [shape: bf16[128,128], index: 1, kind: input, shape index: {}]   ;;  %s751_s2 = inlined_call_operand.vmem [shape: f32[1,128], index: 2, kind: input, shape index: {}]   ;;  %s752_s3 = inlined_call_operand.vmem [shape: f32[1,128], index: 3, kind: input, shape index: {}]   ;;  %s753_s4 = inlined_call_operand.vmem [shape: f32[1,128], index: 4, kind: input, shape index: {}]   ;;  %s754_s5 = inlined_call_operand.vmem [shape: bf16[32,128], index: 5, kind: output, shape index: {}]  }
   0x1   :  { %s680_s20 = smov 0  }
   0x2 LB: > { %s27_s21 = sadd.s32 1, %s640_s19  ;;  %p539_p0 = scmp.ge.s32.totalorder %s644_s20, 1  ;;  %s644_s20 = sphi %s680_s20, %s15_s20   ;;  %s640_s19 = sphi %s678_s19, %s756_s19   ;;  %s636_s18 = sphi %s676_s18, %s755_s18  }
   0x3   : > { %p29_p1 = scmp.ge.s32.totalorder %s27_s21, 2  ;;  %p232_p2 = scmp.lt.s32.totalorder %s644_s20, 3 }
   0x5   : > { %s758_s21 = smov (%p29_p1, %s27_s21), 0  ;;  %p233_p3 = pnand %p539_p0, %p232_p2 }
   0x6   : > { %s540_s24 = sshll.u32 (!%p233_p3), %s636_s18, 1 }
   0x7   : > { %236 = sbr.rel (%p233_p3) target bundleno = 183 (0xb7), region = 40  ;;  %p275_p4 = scmp.lt.s32.totalorder (!%p233_p3), %s540_s24, 3 }
   0xc   : > { %v585_v0 = vld [vmem:[%s750_s1 + $0x38] sm:$0xff]  ;;  %v584_v1 = vld [vmem:[%s750_s1 + $0x30] sm:$0xff]  ;;  %s760_s24 = smov (!%p275_p4, %s540_s24), 3  ;;  %v583_v2 = vld [vmem:[%s750_s1 + $0x28] sm:$0xff] }
   0xd   : > { %392 = vmatpush.bf16.msra.mxu0 %v585_v0  ;;  %s541_s27 = sshll.u32 %s760_s24, 2  ;;  %v582_v3 = vld [vmem:[%s750_s1 + $0x20] sm:$0xff]  ;;  %v581_v8 = vld [vmem:[%s750_s1 + $0x18] sm:$0xff]  ;;  %v580_v12 = vld [vmem:[%s750_s1 + $0x10] sm:$0xff] }
   0xe   : > { %s281_s7 = scalar_lea.vmem %s749_s0, %s541_s27  ;;  %v619_v7 = vld [vmem:[%s751_s2] ss:$0 sm:$0xff]  ;;  %v579_v15 = vld [vmem:[%s750_s1 + $0x8] sm:$0xff]  ;;  %s299_s6 = scalar_lea.vmem %s754_s5, %s541_s27 }
   0xf   : > { %v587_v4 = vld [vmem:[%s281_s7] sm:$0xff]  }
  0x10   : > { %v588_v5 = vunpack.c.l.bf16 %v587_v4  ;;  %v589_v6 = vunpack.c.h.bf16 %v587_v4  ;;  %v620_v11 = vld [vmem:[%s752_s3] ss:$0 sm:$0xff] }
  0x11   : > { %393 = vmatpush.bf16.msra.mxu0 %v584_v1  ;;  %v578_v18 = vld [vmem:[%s750_s1] sm:$0xff] }
  0x12   : > { %v315_v9 = vmul.f32 %v619_v7, %v588_v5  ;;  %v316_v10 = vmul.f32 %v619_v7, %v589_v6  ;;  %v621_v21 = vld [vmem:[%s753_s4] ss:$0 sm:$0xff] }
  0x14   : > { %v321_v13 = vadd.f32 %v620_v11, %v315_v9  ;;  %v322_v14 = vadd.f32 %v620_v11, %v316_v10 }
  0x15   : > { %394 = vmatpush.bf16.msra.mxu0 %v583_v2 }
  0x16   : > { %v323_v16 = vmax.f32 %v321_v13, 0.0  ;;  %v324_v17 = vmax.f32 %v322_v14, 0.0 }
  0x18   : > { %v325_v19 = vpack.c.bf16 %v324_v17, %v323_v16 }
  0x19   : > { %395 = vmatpush.bf16.msra.mxu0 %v582_v3 }
  0x1d   : > { %396 = vmatpush.bf16.msra.mxu0 %v581_v8 }
  0x21   : > { %397 = vmatpush.bf16.msra.mxu0 %v580_v12 }
  0x25   : > { %398 = vmatpush.bf16.msra.mxu0 %v579_v15 }
  0x29   : > { %399 = vmatpush.bf16.msra.mxu0 %v578_v18 }
  0x2c   : > { %400 = vmatmul.bf16.vlgmr.msra.gmra.mxu0 %v325_v19 }
  0xa9   : > { %v401_v20 = vpop.f32.mrf.mxu0 }
  0xaa   : > { %v419_v23 = vadd.f32 %v621_v21, %v401_v20 }
  0xb1   : > { %v403_v22 = vpop.f32.mrf.mxu0 }
  0xb2   : > { %v420_v24 = vadd.f32 %v621_v21, %v403_v22 }
  0xb4   : > { %v593_v25 = vpack.c.bf16 %v420_v24, %v419_v23 }
  0xb6   : > { %594 = vst [vmem:[%s299_s6] sm:$0xff] %v593_v25  }
  0xb7 PF: > { %s15_s20 = sadd.s32 1, %s644_s20   ;;  %s755_s18 = smov %s640_s19 }
  0xb8   : > { %p12_p5 = scmp.ge.s32.totalorder %s15_s20, 4   ;;  %s756_s19 = smov %s758_s21 }
  0xba   :  { %14 = sbr.rel (!%p12_p5) target bundleno = 2 (0x2), region = 87 }

// kernel: pretrained_resnet50_forward.16
= control target key start
LH: loop header
LB: loop body
LE: loop exit
PB: predicated region body
PF: predicated region fallthrough
CT: control target
= control target key end

     0   :  { %s324_s6 = smov 0   ;;  %s326_s7 = smov 0   ;;  %s363_s0 = inlined_call_operand.vmem [shape: bf16[4,16,128], index: 0, kind: input, shape index: {}]   ;;  %s364_s1 = inlined_call_operand.vmem [shape: bf16[16,128], index: 1, kind: output, shape index: {}]  }
   0x1   :  { %s328_s8 = smov 0  }
   0x2 LB: > { %s20_s9 = sadd.s32 1, %s307_s7  ;;  %p245_p0 = scmp.ge.s32.totalorder %s311_s8, 1  ;;  %s311_s8 = sphi %s328_s8, %s11_s8   ;;  %s307_s7 = sphi %s326_s7, %s366_s7   ;;  %s303_s6 = sphi %s324_s6, %s365_s6  }
   0x3   : > { %p21_p1 = scmp.ge.s32.totalorder %s20_s9, 4  ;;  %p106_p2 = scmp.lt.s32.totalorder %s311_s8, 5 }
   0x5   : > { %s368_s9 = smov (%p21_p1, %s20_s9), 0  ;;  %p107_p3 = pnand %p245_p0, %p106_p2 }
   0x6   : > { %p131_p4 = scmp.lt.s32.totalorder (!%p107_p3), %s303_s6, 3  ;;  %p248_p5 = scmp.ne.s32.totalorder (!%p107_p3), %s303_s6, 0 }
   0x7   : > { %110 = sbr.rel (%p107_p3) target bundleno = 43 (0x2b), region = 24 }
   0xc   : > { %s132_s10 = scalar_select %p131_p4, %s303_s6, 3 }
   0xd   : > { %149 = sbr.rel (%p248_p5) target bundleno = 21 (0x15), region = 28 }
   0xe   : > { %s254_s11 = sshll.u32 %s132_s10, 3 }
   0xf   : > { %s138_s14 = scalar_lea.vmem %s363_s0, %s254_s11 }
  0x12   : > { %v313_v0 = vmov 0.0  }
  0x13   : > { %150 = vst [vmem:[#allocation2] sm:$0xff] %v313_v0 }
  0x14   : > { %151 = vst [vmem:[#allocation2 + $0x8] sm:$0xff] %v313_v0 }
  0x15 PF: > { %v256_v1 = vld [vmem:[%s138_s14] sm:$0xff]   ;;  %p249_p6 = scmp.ne.s32.totalorder %s303_s6, 3 }
  0x16   : > { %v257_v4 = vunpack.c.l.bf16 %v256_v1  ;;  %v258_v5 = vunpack.c.h.bf16 %v256_v1 }
  0x1a   : > { %v156_v2 = vld [vmem:[#allocation2] sm:$0xff]  ;;  %165 = sbr.rel (%p249_p6) target bundleno = 43 (0x2b), region = 32 }
  0x1b   : > { %v157_v3 = vld [vmem:[#allocation2 + $0x8] sm:$0xff]  ;;  %v158_v6 = vadd.f32 %v257_v4, %v156_v2 }
  0x1c   : > { %v159_v7 = vadd.f32 %v258_v5, %v157_v3 }
  0x1d   : > { %160 = vst [vmem:[#allocation2] sm:$0xff] %v158_v6 }
  0x1e   : > { %161 = vst [vmem:[#allocation2 + $0x8] sm:$0xff] %v159_v7 }
  0x24   : > { %v166_v8 = vld [vmem:[#allocation2] sm:$0xff] }
  0x25   : > { %v167_v9 = vld [vmem:[#allocation2 + $0x8] sm:$0xff]  ;;  %v168_v10 = vmul.f32 0.25, %v166_v8 }
  0x26   : > { %v169_v11 = vmul.f32 0.25, %v167_v9 }
  0x28   : > { %v262_v12 = vpack.c.bf16 %v169_v11, %v168_v10 }
  0x2a   : > { %263 = vst [vmem:[%s364_s1] sm:$0xff] %v262_v12  }
  0x2b PF: > { %s11_s8 = sadd.s32 1, %s311_s8   ;;  %s365_s6 = smov %s307_s7 }
  0x2c   : > { %p8_p7 = scmp.ge.s32.totalorder %s11_s8, 6   ;;  %s366_s7 = smov %s368_s9 }
  0x2e   :  { %10 = sbr.rel (!%p8_p7) target bundleno = 2 (0x2), region = 62 }

// kernel: pretrained_resnet50_forward.17
= control target key start
LH: loop header
LB: loop body
LE: loop exit
PB: predicated region body
PF: predicated region fallthrough
CT: control target
= control target key end

     0   :  { %vm71_vm0 = vcmask 1043456   ;;  %s486_s0 = inlined_call_operand.vmem [shape: bf16[8,4,128], index: 0, kind: input, shape index: {}]   ;;  %s487_s1 = inlined_call_operand.vmem [shape: f32[1,1,128], index: 1, kind: input, shape index: {}]   ;;  %s488_s2 = inlined_call_operand.vmem [shape: f32[1,1,128], index: 2, kind: input, shape index: {}]   ;;  %s489_s3 = inlined_call_operand.vmem [shape: bf16[128,128], index: 3, kind: input, shape index: {}]   ;;  %s490_s4 = inlined_call_operand.vmem [shape: f32[1,128], index: 4, kind: input, shape index: {}]   ;;  %s491_s5 = inlined_call_operand.hbm [shape: f32[8,128], index: 5, kind: output, shape index: {0}]   ;;  %s492_s6 = inlined_call_operand.vmem [shape: f32[8,128], index: 6, kind: output, shape index: {1}]  }
   0x1   :  { %v334_v0 = vld [vmem:[%s489_s3 + $0x38] sm:$0xff]  ;;  %v333_v1 = vld [vmem:[%s489_s3 + $0x30] sm:$0xff]  ;;  %v23_v2 = vld [vmem:[%s486_s0] sm:$0x3] }
   0x2   :  { %261 = vmatpush.bf16.msra.mxu0 %v334_v0  ;;  %v24_v3 = vld [vmem:[%s486_s0 + $0x2] sm:$0x3]  ;;  %v25_v4 = vld [vmem:[%s486_s0 + $0x4] sm:$0x3]  ;;  %v26_v5 = vld [vmem:[%s486_s0 + $0x6] sm:$0x3]  ;;  %v31_v6 = vunpack.c.l.bf16 %v23_v2 }
   0x3   :  { %v332_v7 = vld [vmem:[%s489_s3 + $0x28] sm:$0xff]  ;;  %v32_v11 = vunpack.c.l.bf16 %v24_v3  ;;  %v33_v12 = vunpack.c.l.bf16 %v25_v4  ;;  %v34_v13 = vunpack.c.l.bf16 %v26_v5  ;;  %v336_v18 = vld [vmem:[%s487_s1] ss:$0 sm:$0xff] }
   0x4   :  { %v27_v8 = vld [vmem:[%s486_s0 + $0x8] sm:$0x3]  ;;  %v28_v9 = vld [vmem:[%s486_s0 + $0xa] sm:$0x3]  ;;  %v29_v10 = vld [vmem:[%s486_s0 + $0xc] sm:$0x3]  ;;  %v43_v21 = vmul.f32 %v336_v18, %v31_v6 }
   0x5   :  { %v30_v14 = vld [vmem:[%s486_s0 + $0xe] sm:$0x3]  ;;  %v35_v15 = vunpack.c.l.bf16 %v27_v8  ;;  %v36_v16 = vunpack.c.l.bf16 %v28_v9  ;;  %v37_v17 = vunpack.c.l.bf16 %v29_v10  ;;  %v337_v20 = vld [vmem:[%s488_s2] ss:$0 sm:$0xff]  ;;  %v44_v22 = vmul.f32 %v336_v18, %v32_v11 }
   0x6   :  { %262 = vmatpush.bf16.msra.mxu0 %v333_v1  ;;  %v38_v19 = vunpack.c.l.bf16 %v30_v14  ;;  %v45_v23 = vmul.f32 %v336_v18, %v33_v12  ;;  %v46_v24 = vmul.f32 %v336_v18, %v34_v13 }
   0x7   :  { %12 = vsyncpa [#allocation3], 0  ;;  %v47_v25 = vmul.f32 %v336_v18, %v35_v15  ;;  %v48_v26 = vmul.f32 %v336_v18, %v36_v16  ;;  %v49_v27 = vmul.f32 %v336_v18, %v37_v17  ;;  %v55_v29 = vadd.f32 %v337_v20, %v43_v21  ;;  %v331_v33 = vld [vmem:[%s489_s3 + $0x20] sm:$0xff]  ;;  %v330_v50 = vld [vmem:[%s489_s3 + $0x18] sm:$0xff]  ;;  %s282_s9 = sshll.u32 %s491_s5, 4  ;;  %s283_s9 = int_to_ptr.hbm [resolvable:$true] %s282_s9 }
   0x8   :  { %v50_v28 = vmul.f32 %v336_v18, %v38_v19  ;;  %v56_v30 = vadd.f32 %v337_v20, %v44_v22  ;;  %v57_v31 = vadd.f32 %v337_v20, %v45_v23  ;;  %v58_v32 = vadd.f32 %v337_v20, %v46_v24  ;;  %v329_v3 = vld [vmem:[%s489_s3 + $0x10] sm:$0xff] }
   0x9   :  { %v59_v34 = vadd.f32 %v337_v20, %v47_v25  ;;  %v60_v35 = vadd.f32 %v337_v20, %v48_v26  ;;  %v61_v36 = vadd.f32 %v337_v20, %v49_v27  ;;  %v63_v38 = vmax.f32 %v55_v29, 0.0 }
   0xa   :  { %263 = vmatpush.bf16.msra.mxu0 %v332_v7  ;;  %v62_v37 = vadd.f32 %v337_v20, %v50_v28  ;;  %v64_v39 = vmax.f32 %v56_v30, 0.0  ;;  %v65_v40 = vmax.f32 %v57_v31, 0.0  ;;  %v66_v41 = vmax.f32 %v58_v32, 0.0  ;;  %v328_v20 = vld [vmem:[%s489_s3 + $0x8] sm:$0xff] }
   0xb   :  { %v67_v42 = vmax.f32 %v59_v34, 0.0  ;;  %v68_v43 = vmax.f32 %v60_v35, 0.0  ;;  %v69_v44 = vmax.f32 %v61_v36, 0.0  ;;  %v72_v46 = vsel %vm71_vm0, %v63_v38, 0.0 }
   0xc   :  { %v70_v45 = vmax.f32 %v62_v37, 0.0  ;;  %v79_v47 = vsel %vm71_vm0, %v64_v39, 0.0  ;;  %v86_v48 = vsel %vm71_vm0, %v65_v40, 0.0  ;;  %v93_v49 = vsel %vm71_vm0, %v66_v41, 0.0  ;;  %v327_v37 = vld [vmem:[%s489_s3] sm:$0xff]  ;;  %s365_s3 = smov [#allocation2]  }
   0xd   :  { %v73_v51 = vrot.slane %v72_v46, 4  ;;  %v80_v52 = vrot.slane %v79_v47, 4  ;;  %v87_v53 = vrot.slane %v86_v48, 4  ;;  %v94_v54 = vrot.slane %v93_v49, 4  ;;  %s280_s30 = sshll.u32 %s365_s3, 4  ;;  %s281_s30 = int_to_ptr.vmem [resolvable:$true] %s280_s30 }
   0xe   :  { %264 = vmatpush.bf16.msra.mxu0 %v331_v33  ;;  %v100_v55 = vsel %vm71_vm0, %v67_v42, 0.0  ;;  %v107_v56 = vsel %vm71_vm0, %v68_v43, 0.0  ;;  %v114_v57 = vsel %vm71_vm0, %v69_v44, 0.0  ;;  %v121_v58 = vsel %vm71_vm0, %v70_v45, 0.0 }
   0xf   :  { %v74_v59 = vadd.f32 %v73_v51, %v72_v46  ;;  %v81_v60 = vadd.f32 %v80_v52, %v79_v47  ;;  %v88_v61 = vadd.f32 %v87_v53, %v86_v48  ;;  %v95_v62 = vadd.f32 %v94_v54, %v93_v49 }
  0x10   :  { %v101_v63 = vrot.slane %v100_v55, 4  ;;  %v108_v0 = vrot.slane %v107_v56, 4  ;;  %v115_v1 = vrot.slane %v114_v57, 4  ;;  %v122_v2 = vrot.slane %v121_v58, 4 }
  0x11   :  { %v75_v4 = vrot.slane %v74_v59, 2  ;;  %v82_v5 = vrot.slane %v81_v60, 2  ;;  %v89_v6 = vrot.slane %v88_v61, 2  ;;  %v96_v7 = vrot.slane %v95_v62, 2 }
  0x12   :  { %265 = vmatpush.bf16.msra.mxu0 %v330_v50  ;;  %v102_v8 = vadd.f32 %v101_v63, %v100_v55  ;;  %v109_v9 = vadd.f32 %v108_v0, %v107_v56  ;;  %v116_v10 = vadd.f32 %v115_v1, %v114_v57  ;;  %v123_v11 = vadd.f32 %v122_v2, %v121_v58 }
  0x13   :  { %v76_v12 = vadd.f32 %v75_v4, %v74_v59  ;;  %v83_v13 = vadd.f32 %v82_v5, %v81_v60  ;;  %v90_v14 = vadd.f32 %v89_v6, %v88_v61  ;;  %v97_v15 = vadd.f32 %v96_v7, %v95_v62 }
  0x14   :  { %v103_v16 = vrot.slane %v102_v8, 2  ;;  %v110_v17 = vrot.slane %v109_v9, 2  ;;  %v117_v18 = vrot.slane %v116_v10, 2  ;;  %v124_v19 = vrot.slane %v123_v11, 2 }
  0x15   :  { %vm144_vm1 = vcmask 1041409   ;;  %v77_v21 = vrot.slane %v76_v12, 1  ;;  %v84_v22 = vrot.slane %v83_v13, 1  ;;  %v91_v23 = vrot.slane %v90_v14, 1 }
  0x16   :  { %266 = vmatpush.bf16.msra.mxu0 %v329_v3  ;;  %v98_v24 = vrot.slane %v97_v15, 1  ;;  %v104_v25 = vadd.f32 %v103_v16, %v102_v8  ;;  %v111_v26 = vadd.f32 %v110_v17, %v109_v9  ;;  %v118_v27 = vadd.f32 %v117_v18, %v116_v10  ;;  %v338_v17 = vld [vmem:[%s490_s4] ss:$0 sm:$0xff] }
  0x17   :  { %v125_v28 = vadd.f32 %v124_v19, %v123_v11  ;;  %vm146_vm2 = vcmask 1042434   ;;  %v78_v29 = vadd.f32 %v77_v21, %v76_v12  ;;  %v85_v30 = vadd.f32 %v84_v22, %v83_v13 }
  0x18   :  { %v92_v31 = vadd.f32 %v91_v23, %v90_v14  ;;  %v99_v32 = vadd.f32 %v98_v24, %v97_v15  ;;  %v105_v33 = vrot.slane %v104_v25, 1  ;;  %v112_v34 = vrot.slane %v111_v26, 1 }
  0x19   :  { %v119_v35 = vrot.slane %v118_v27, 1  ;;  %v126_v36 = vrot.slane %v125_v28, 1  ;;  %v128_v38 = vmul.f32 0.25, %v78_v29  ;;  %v129_v39 = vmul.f32 0.25, %v85_v30 }
  0x1a   :  { %267 = vmatpush.bf16.msra.mxu0 %v328_v20  ;;  %v130_v40 = vmul.f32 0.25, %v92_v31  ;;  %v131_v41 = vmul.f32 0.25, %v99_v32  ;;  %v106_v42 = vadd.f32 %v105_v33, %v104_v25  ;;  %v113_v43 = vadd.f32 %v112_v34, %v111_v26 }
  0x1b   :  { %v120_v44 = vadd.f32 %v119_v35, %v118_v27  ;;  %v127_v45 = vadd.f32 %v126_v36, %v125_v28  ;;  %v160_v46 = vpack.c.bf16 %v128_v38, %v128_v38  ;;  %v161_v47 = vpack.c.bf16 %v129_v39, %v129_v39 }
  0x1c   :  { %v162_v48 = vpack.c.bf16 %v130_v40, %v130_v40  ;;  %v163_v49 = vpack.c.bf16 %v131_v41, %v131_v41  ;;  %v132_v50 = vmul.f32 0.25, %v106_v42  ;;  %v133_v51 = vmul.f32 0.25, %v113_v43 }
  0x1d   :  { %v134_v52 = vmul.f32 0.25, %v120_v44  ;;  %v135_v53 = vmul.f32 0.25, %v127_v45  ;;  %v196_v54 = vunpack.c.l.b16 %v160_v46  ;;  %v197_v55 = vunpack.c.l.b16 %v161_v47 }
  0x1e   :  { %268 = vmatpush.bf16.msra.mxu0 %v327_v37  ;;  %v198_v56 = vunpack.c.l.b16 %v162_v48  ;;  %v199_v57 = vunpack.c.l.b16 %v163_v49  ;;  %v164_v58 = vpack.c.bf16 %v132_v50, %v132_v50  ;;  %v165_v59 = vpack.c.bf16 %v133_v51, %v133_v51 }
  0x1f   :  { %v166_v60 = vpack.c.bf16 %v134_v52, %v134_v52  ;;  %v167_v61 = vpack.c.bf16 %v135_v53, %v135_v53  ;;  %vm148_vm3 = vcmask 1043459   ;;  %v204_v62 = vsel %vm144_vm1, %v197_v55, %v196_v54 }
  0x20   :  { %vm150_vm4 = vcmask 1044484   ;;  %v200_v63 = vunpack.c.l.b16 %v164_v58  ;;  %v201_v0 = vunpack.c.l.b16 %v165_v59  ;;  %vm152_vm5 = vcmask 1045509  }
  0x21   :  { %v202_v1 = vunpack.c.l.b16 %v166_v60  ;;  %v205_v2 = vsel %vm146_vm2, %v198_v56, %v204_v62  ;;  %vm154_vm6 = vcmask 1046534   ;;  %v203_v3 = vunpack.c.l.b16 %v167_v61 }
  0x22   :  { %v206_v4 = vsel %vm148_vm3, %v199_v57, %v205_v2  ;;  %vm156_vm7 = vcmask 1047559   ;;  %v145_v10 = vsel %vm144_vm1, %v129_v39, %v128_v38 }
  0x23   :  { %v207_v5 = vsel %vm150_vm4, %v200_v63, %v206_v4  ;;  %v147_v11 = vsel %vm146_vm2, %v130_v40, %v145_v10 }
  0x24   :  { %v208_v6 = vsel %vm152_vm5, %v201_v0, %v207_v5  ;;  %v149_v12 = vsel %vm148_vm3, %v131_v41, %v147_v11 }
  0x25   :  { %v209_v7 = vsel %vm154_vm6, %v202_v1, %v208_v6  ;;  %v151_v13 = vsel %vm150_vm4, %v132_v50, %v149_v12 }
  0x26   :  { %v210_v8 = vsel %vm156_vm7, %v203_v3, %v209_v7  ;;  %v153_v14 = vsel %vm152_vm5, %v133_v51, %v151_v13 }
  0x27   :  { %v211_v9 = vpack.c.b16 %v210_v8, %v210_v8  ;;  %v155_v15 = vsel %vm154_vm6, %v134_v52, %v153_v14 }
  0x28   :  { %v157_v16 = vsel %vm156_vm7, %v135_v53, %v155_v15 }
  0x29   :  { %269 = vmatmul.bf16.vlgmr.msra.gmra.mxu0 %v211_v9  ;;  %159 = vst [vmem:[#allocation2] sm:$0xff] %v157_v16 }
  0x2a   :  { %285 = dma.vmem_to_hbm [thread:$0]  %s281_s30, 128, %s283_s9, [#allocation3]  }
  0xa6   :  { %v270_v18 = vpop.f32.mrf.mxu0 }
  0xa7   :  { %v271_v19 = vadd.f32 %v338_v17, %v270_v18 }
  0xa9   :  { %274 = vst [vmem:[%s492_s6] sm:$0xff] %v271_v19 }
  0xae   :  { %v272_v20 = vpop.f32.mrf.mxu0 }
  0xaf   :  { %363 = dma.done.wait [#allocation3], 128  }
  0xb0   :  { %364 = vsyncadd [#allocation3], 4294967168 }
  0xb1   :  { %294 = vsyncpa [#allocation3], 1 }

</bundles_post_ra>
